<compile_context>
chip_gen: v5e
topology: v5e:2x2
jax: 0.10.0
libtpu: 0.0.40
codegen_flags: <defaults>
</compile_context>

<pallas_src>
from functools import partial

import numpy as np
import jax
import jax.numpy as jnp
from jax.experimental import pallas as pl
from jax.experimental.pallas import tpu as pltpu

LANE = 128  # TPU lane width: pad all feature dims to multiples of this


def _round_up(n, m):
    return ((n + m - 1) // m) * m


def _vmem_capacity_bytes():
    """Physical VMEM capacity of the local TPU (fallback safe for all gens)."""
    try:
        info = pltpu.get_tpu_info()
        cap = int(getattr(info, "vmem_capacity_bytes", 0))
        if cap > 0:
            return cap
    except Exception:
        pass
    return 64 * 1024 * 1024  # conservative (v7x-sized) fallback


def _choose_row_tile(n, d_pad, o_pad, width_max, resident_bytes, vmem_cap):
    """Pick the largest 128-multiple row tile that (a) fits the VMEM budget and
    (b) exactly divides the 128-padded batch (so padding waste stays <= 127 rows)."""
    n_pad = _round_up(max(int(n), 1), LANE)
    budget = int(vmem_cap * 0.85)
    max_tile = 2048 if vmem_cap >= 96 * 1024 * 1024 else 1024  # v5e/v6e vs v7x
    # Per-row VMEM: double-buffered x(bf16) + label(bf16) + h_out(bf16) + mask(f32),
    # plus live f32/bf16 intermediates inside the kernel (~6 B per widest feature).
    per_row = 2 * (2 * d_pad + 2 * o_pad + 2 * o_pad + 4) + 6 * width_max
    avail = max(budget - resident_bytes, per_row * LANE)
    tn_budget = max(LANE, min(max_tile, (avail // per_row) // LANE * LANE))
    blocks = n_pad // LANE
    best = 1
    for d in range(1, blocks + 1):
        if blocks % d == 0 and d * LANE <= tn_budget:
            best = d
    return best * LANE, n_pad


# ---------------------------------------------------------------------------
# Fused Pallas kernel: (Linear -> ReLU)^(L-1) -> Linear -> masked-MSE partials
# ---------------------------------------------------------------------------

def _fused_mlp_kernel(*refs, num_layers):
    # refs = [x, w1, b1, ..., wL, bL, label, mask] + [h_out, num_part, cnt_part]
    n_in = 3 + 2 * num_layers
    x_ref = refs[0]
    wb_refs = refs[1:1 + 2 * num_layers]
    label_ref = refs[n_in - 2]
    mask_ref = refs[n_in - 1]
    h_ref = refs[n_in]
    num_ref = refs[n_in + 1]   # (1,1) per-tile masked SSE partial
    cnt_ref = refs[n_in + 2]   # (1,1) per-tile masked row count partial

    # ---- MLP chain: bf16 MXU operands, f32 accumulation / epilogue ----
    h = x_ref[...]                                        # bf16 (tn, d_pad)
    for l in range(num_layers):
        w_ref = wb_refs[2 * l]
        b_ref = wb_refs[2 * l + 1]
        y = jnp.dot(h, w_ref[...], preferred_element_type=jnp.float32)
        y = y + b_ref[...]                                # f32 bias add
        if l < num_layers - 1:
            y = jnp.maximum(y, 0.0)                       # f32 ReLU
            h = y.astype(jnp.bfloat16)                    # bf16 only for next matmul
        else:
            h = y                                         # final layer stays f32

    h_ref[...] = h.astype(h_ref.dtype)                    # lane-dense bf16 store

    # ---- per-tile masked-MSE partials (no cross-tile state -> "parallel") ----
    diff = h - label_ref[...].astype(jnp.float32)         # padded cols are 0
    m = mask_ref[...]                                     # (tn, 1) f32 {0,1}; padded rows 0
    num_ref[...] = jnp.sum(diff * diff * m, axis=(0, 1), keepdims=True)
    cnt_ref[...] = jnp.sum(m, axis=(0, 1), keepdims=True)


def fused_mlp_pallas(x_p, params_p, label_p, mask_p, *, tn, vmem_limit,
                     single_buffer_weights):
    n_pad, d_pad = x_p.shape
    o_pad = label_p.shape[1]
    num_layers = len(params_p)
    n_tiles = n_pad // tn
    grid = (n_tiles,)

    # Resident weights/biases: constant index_map; single-buffer if supported.
    wb_kwargs = dict(pipeline_mode=pl.Buffered(1)) if single_buffer_weights else {}

    in_specs = [pl.BlockSpec((tn, d_pad), lambda i: (i, 0))]        # x: row-tiled
    flat_inputs = [x_p]
    for (w, b) in params_p:
        in_specs.append(pl.BlockSpec(w.shape, lambda i: (0, 0), **wb_kwargs))
        in_specs.append(pl.BlockSpec(b.shape, lambda i: (0, 0), **wb_kwargs))
        flat_inputs += [w, b]
    in_specs.append(pl.BlockSpec((tn, o_pad), lambda i: (i, 0)))    # label: row-tiled
    in_specs.append(pl.BlockSpec((tn, 1), lambda i: (i, 0)))        # mask:  row-tiled
    flat_inputs += [label_p, mask_p]

    out_shape = (
        jax.ShapeDtypeStruct((n_pad, o_pad), jnp.bfloat16),  # predictions (padded)
        jax.ShapeDtypeStruct((n_tiles, 1), jnp.float32),     # per-tile masked SSE
        jax.ShapeDtypeStruct((n_tiles, 1), jnp.float32),     # per-tile masked row count
    )
    out_specs = (
        pl.BlockSpec((tn, o_pad), lambda i: (i, 0)),
        pl.BlockSpec((1, 1), lambda i: (i, 0)),
        pl.BlockSpec((1, 1), lambda i: (i, 0)),
    )

    def _nbytes(a):
        return int(a.size) * a.dtype.itemsize

    flops = 2 * n_pad * sum(int(w.shape[0]) * int(w.shape[1]) for w, _ in params_p)
    bytes_accessed = (_nbytes(x_p) + _nbytes(label_p) + _nbytes(mask_p)
                      + sum(_nbytes(w) + _nbytes(b) for w, b in params_p)
                      + n_pad * o_pad * 2 + 2 * n_tiles * 4)
    cost = pl.CostEstimate(flops=int(flops), transcendentals=0,
                           bytes_accessed=int(bytes_accessed))

    h_p, num_parts, cnt_parts = pl.pallas_call(
        partial(_fused_mlp_kernel, num_layers=num_layers),
        grid=grid,
        out_shape=out_shape,
        in_specs=in_specs,
        out_specs=out_specs,
        compiler_params=pltpu.CompilerParams(
            # Every tile writes disjoint output blocks -> safe to shard across
            # TensorCores (v7x megacore). No-op on single-TC v5e/v6e.
            dimension_semantics=("parallel",),
            vmem_limit_bytes=int(vmem_limit),
        ),
        cost_estimate=cost,
    )(*flat_inputs)
    return h_p, num_parts, cnt_parts


# ---------------------------------------------------------------------------
# Parameter init (matches torch.nn.Linear default init scheme) + padding
# ---------------------------------------------------------------------------

def init_mlp_params(key, in_dim, out_dim, num_layers, hid_dim):
    dims = [in_dim] + [hid_dim] * (num_layers - 1) + [out_dim]
    params = []
    for i in range(1, len(dims)):
        key, kw, kb = jax.random.split(key, 3)
        fan_in = dims[i - 1]
        bound = 1.0 / float(np.sqrt(fan_in))
        w = jax.random.uniform(kw, (dims[i - 1], dims[i]), jnp.float32, -bound, bound)
        b = jax.random.uniform(kb, (dims[i],), jnp.float32, -bound, bound)
        params.append((w, b))
    return params


def prepare_params(params):
    """Zero-pad feature dims to multiples of 128 (not 256 — the kernel is
    HBM-bound, extra padding is pure extra DMA bytes) and cast weights to bf16.
    Padded cols of the final W/b MUST stay exactly zero so the padded columns
    of the prediction are zero (loss correctness relies on it)."""
    prepped = []
    for w, b in params:
        din, dout = w.shape
        dp, op = _round_up(din, LANE), _round_up(dout, LANE)
        wp = jnp.zeros((dp, op), jnp.bfloat16).at[:din, :dout].set(w.astype(jnp.bfloat16))
        bp = jnp.zeros((1, op), jnp.float32).at[0, :dout].set(b)
        prepped.append((wp, bp))
    return prepped


# ---------------------------------------------------------------------------
# Forward pass mirroring MLP.forward
# ---------------------------------------------------------------------------

@partial(jax.jit, static_argnames=("single_buffer_weights",))
def _mlp_forward_core(x_seq, label, loss_mask, params_p, *, single_buffer_weights=True):
    n, in_dim = x_seq.shape
    out_dim = label.shape[1]
    d_pad = params_p[0][0].shape[0]
    o_pad = params_p[-1][0].shape[1]
    width_max = max([d_pad] + [w.shape[1] for w, _ in params_p])

    vmem_cap = _vmem_capacity_bytes()
    resident = 2 * sum(int(w.size) * w.dtype.itemsize + int(b.size) * b.dtype.itemsize
                       for w, b in params_p)  # conservative: assume double-buffered
    tn, n_pad = _choose_row_tile(n, d_pad, o_pad, width_max, resident, vmem_cap)

    # NOTE: padding is done once per call here; for real cite-seq workloads hoist
    # the feature-dim padding of x/label into dataset preparation to avoid the
    # extra HBM round trip before the (mem-bound) kernel.
    x_p = jnp.zeros((n_pad, d_pad), jnp.bfloat16).at[:n, :in_dim].set(
        x_seq.astype(jnp.bfloat16))
    label_p = jnp.zeros((n_pad, o_pad), jnp.bfloat16).at[:n, :out_dim].set(
        label.astype(jnp.bfloat16))
    mask_p = jnp.zeros((n_pad, 1), jnp.float32).at[:n, 0].set(
        loss_mask.astype(jnp.float32))

    h_p, num_parts, cnt_parts = fused_mlp_pallas(
        x_p, params_p, label_p, mask_p,
        tn=tn, vmem_limit=int(vmem_cap * 0.85),
        single_buffer_weights=single_buffer_weights)

    h = h_p[:n, :out_dim].astype(jnp.float32)
    num = jnp.sum(num_parts)
    cnt = jnp.sum(cnt_parts)
    # mean over masked elements; guard against an all-False mask
    loss = num / (jnp.maximum(cnt, 1.0) * out_dim)
    return h, loss


def mlp_forward(x, params_p):
    # h = x['RNA']['x_seq'].to_dense()  -- input is already dense here
    args = (x['RNA']['x_seq'], x['RNA']['label'], x['RNA']['loss_mask'], params_p)
    try:
        h, loss = _mlp_forward_core(*args, single_buffer_weights=True)
        h = jax.block_until_ready(h)
    except Exception:
        # Fallback: this build rejected single-buffered (pl.Buffered(1)) resident
        # weights; rerun with default double-buffering (correctness identical).
        h, loss = _mlp_forward_core(*args, single_buffer_weights=False)
        h = jax.block_until_ready(h)

    # TODO(synk): boolean row-gather has a dynamic output shape -> done on host,
    # outside the jitted / Pallas hot path (matches torch's h[loss_mask, :]).
    mask_np = np.asarray(x['RNA']['loss_mask'])
    out_dict = {
        'pred': np.asarray(h)[mask_np, :],
        'label': np.asarray(x['RNA']['label'])[mask_np, :],
    }
    return out_dict, loss


# ---------------------------------------------------------------------------
# Pure-JAX reference (f32) for a correctness sanity check
# ---------------------------------------------------------------------------

def reference_forward(x_seq, label, loss_mask, params):
    h = x_seq
    for i, (w, b) in enumerate(params):
        h = h @ w + b
        if i < len(params) - 1:
            h = jnp.maximum(h, 0.0)
    pred = h[np.asarray(loss_mask), :]
    lab = label[np.asarray(loss_mask), :]
    loss = jnp.mean((pred - lab) ** 2)
    return h, loss


# ---------------------------------------------------------------------------
# Main
# ---------------------------------------------------------------------------

if __name__ == "__main__":
    key = jax.random.PRNGKey(0)

    batch = 8
    in_dim = 32
    hid_dim = 32
    out_dim = 16
    num_layers = 3

    key, kx, kl, kp = jax.random.split(key, 4)
    x_seq = jax.random.normal(kx, (batch, in_dim), jnp.float32)
    label = jax.random.normal(kl, (batch, out_dim), jnp.float32)
    loss_mask = jnp.array([True, False, True, True, False, True, False, True])

    x = {'RNA': {'x_seq': x_seq, 'loss_mask': loss_mask, 'label': label}}

    params = init_mlp_params(kp, in_dim, out_dim, num_layers, hid_dim)
    params_p = prepare_params(params)

    out_dict, loss = mlp_forward(x, params_p)
    loss = jax.block_until_ready(loss)

    # sanity: masked rows only, finite loss
    n_masked = int(np.asarray(loss_mask).sum())
    assert out_dict['pred'].shape == (n_masked, out_dim)
    assert out_dict['label'].shape == (n_masked, out_dim)
    assert np.isfinite(float(loss))

    # numerical check vs f32 reference (bf16 MXU operands / bf16 label & pred
    # storage are intentional -> loose tolerance)
    h_ref, loss_ref = reference_forward(x_seq, label, loss_mask, params)
    np.testing.assert_allclose(np.asarray(out_dict['pred'], dtype=np.float32),
                               np.asarray(h_ref)[np.asarray(loss_mask), :],
                               rtol=1e-1, atol=1e-1)
    np.testing.assert_allclose(float(loss), float(loss_ref), rtol=1e-1, atol=1e-1)

    print("KERNEL_OK")
</pallas_src>

<mosaic_0001>
module attributes {stable_mosaic.version = 11 : i64} {
  func.func @_fused_mlp_kernel(%arg0: i32, %arg1: memref<128x128xbf16, #tpu.memory_space<vmem>>, %arg2: memref<128x128xbf16, #tpu.memory_space<vmem>>, %arg3: memref<1x128xf32, #tpu.memory_space<vmem>>, %arg4: memref<128x128xbf16, #tpu.memory_space<vmem>>, %arg5: memref<1x128xf32, #tpu.memory_space<vmem>>, %arg6: memref<128x128xbf16, #tpu.memory_space<vmem>>, %arg7: memref<1x128xf32, #tpu.memory_space<vmem>>, %arg8: memref<128x128xbf16, #tpu.memory_space<vmem>>, %arg9: memref<128x1xf32, #tpu.memory_space<vmem>>, %arg10: memref<128x128xbf16, #tpu.memory_space<vmem>>, %arg11: memref<1x1xf32, #tpu.memory_space<vmem>>, %arg12: memref<1x1xf32, #tpu.memory_space<vmem>>) attributes {dimension_semantics = [#tpu.dimension_semantics<parallel>], iteration_bounds = array<i64: 1>, scalar_prefetch = 0 : i64, scratch_operands = 0 : i64, tpu.core_type = #tpu.core_type<tc>, window_params = [{transform_indices = @transform_0, window_bounds = array<i64: 128, 128>}, {pipeline_mode = #tpu.pipeline_mode<synchronous>, transform_indices = @transform_1, window_bounds = array<i64: 128, 128>}, {pipeline_mode = #tpu.pipeline_mode<synchronous>, transform_indices = @transform_2, window_bounds = array<i64: 1, 128>}, {pipeline_mode = #tpu.pipeline_mode<synchronous>, transform_indices = @transform_3, window_bounds = array<i64: 128, 128>}, {pipeline_mode = #tpu.pipeline_mode<synchronous>, transform_indices = @transform_4, window_bounds = array<i64: 1, 128>}, {pipeline_mode = #tpu.pipeline_mode<synchronous>, transform_indices = @transform_5, window_bounds = array<i64: 128, 128>}, {pipeline_mode = #tpu.pipeline_mode<synchronous>, transform_indices = @transform_6, window_bounds = array<i64: 1, 128>}, {transform_indices = @transform_7, window_bounds = array<i64: 128, 128>}, {transform_indices = @transform_8, window_bounds = array<i64: 128, 1>}, {transform_indices = @transform_9, window_bounds = array<i64: 128, 128>}, {transform_indices = @transform_10, window_bounds = array<i64: 1, 1>}, {transform_indices = @transform_11, window_bounds = array<i64: 1, 1>}]} {
    %c0 = arith.constant 0 : index
    %c0_0 = arith.constant 0 : index
    %0 = vector.load %arg1[%c0, %c0_0] : memref<128x128xbf16, #tpu.memory_space<vmem>>, vector<128x128xbf16>
    %c0_1 = arith.constant 0 : index
    %c0_2 = arith.constant 0 : index
    %1 = vector.load %arg2[%c0_1, %c0_2] : memref<128x128xbf16, #tpu.memory_space<vmem>>, vector<128x128xbf16>
    %cst = arith.constant dense<0.000000e+00> : vector<128x128xf32>
    %2 = tpu.matmul %0, %1, %cst {dimension_numbers = #tpu.dot_dimension_numbers<[1], [0], [0], [1], [0, 0, 1, 1], [], []>} : vector<128x128xbf16>, vector<128x128xbf16>, vector<128x128xf32> -> vector<128x128xf32>
    %c0_3 = arith.constant 0 : index
    %c0_4 = arith.constant 0 : index
    %3 = vector.load %arg3[%c0_3, %c0_4] : memref<1x128xf32, #tpu.memory_space<vmem>>, vector<1x128xf32>
    %4 = vector.broadcast %3 : vector<1x128xf32> to vector<128x128xf32>
    %5 = arith.addf %2, %4 : vector<128x128xf32>
    %cst_5 = arith.constant 0.000000e+00 : f32
    %6 = vector.broadcast %cst_5 : f32 to vector<128x128xf32>
    %7 = arith.maximumf %5, %6 : vector<128x128xf32>
    %8 = arith.truncf %7 : vector<128x128xf32> to vector<128x128xbf16>
    %c0_6 = arith.constant 0 : index
    %c0_7 = arith.constant 0 : index
    %9 = vector.load %arg4[%c0_6, %c0_7] : memref<128x128xbf16, #tpu.memory_space<vmem>>, vector<128x128xbf16>
    %cst_8 = arith.constant dense<0.000000e+00> : vector<128x128xf32>
    %10 = tpu.matmul %8, %9, %cst_8 {dimension_numbers = #tpu.dot_dimension_numbers<[1], [0], [0], [1], [0, 0, 1, 1], [], []>} : vector<128x128xbf16>, vector<128x128xbf16>, vector<128x128xf32> -> vector<128x128xf32>
    %c0_9 = arith.constant 0 : index
    %c0_10 = arith.constant 0 : index
    %11 = vector.load %arg5[%c0_9, %c0_10] : memref<1x128xf32, #tpu.memory_space<vmem>>, vector<1x128xf32>
    %12 = vector.broadcast %11 : vector<1x128xf32> to vector<128x128xf32>
    %13 = arith.addf %10, %12 : vector<128x128xf32>
    %cst_11 = arith.constant 0.000000e+00 : f32
    %14 = vector.broadcast %cst_11 : f32 to vector<128x128xf32>
    %15 = arith.maximumf %13, %14 : vector<128x128xf32>
    %16 = arith.truncf %15 : vector<128x128xf32> to vector<128x128xbf16>
    %c0_12 = arith.constant 0 : index
    %c0_13 = arith.constant 0 : index
    %17 = vector.load %arg6[%c0_12, %c0_13] : memref<128x128xbf16, #tpu.memory_space<vmem>>, vector<128x128xbf16>
    %cst_14 = arith.constant dense<0.000000e+00> : vector<128x128xf32>
    %18 = tpu.matmul %16, %17, %cst_14 {dimension_numbers = #tpu.dot_dimension_numbers<[1], [0], [0], [1], [0, 0, 1, 1], [], []>} : vector<128x128xbf16>, vector<128x128xbf16>, vector<128x128xf32> -> vector<128x128xf32>
    %c0_15 = arith.constant 0 : index
    %c0_16 = arith.constant 0 : index
    %19 = vector.load %arg7[%c0_15, %c0_16] : memref<1x128xf32, #tpu.memory_space<vmem>>, vector<1x128xf32>
    %20 = vector.broadcast %19 : vector<1x128xf32> to vector<128x128xf32>
    %21 = arith.addf %18, %20 : vector<128x128xf32>
    %22 = arith.truncf %21 : vector<128x128xf32> to vector<128x128xbf16>
    %c0_17 = arith.constant 0 : index
    %c0_18 = arith.constant 0 : index
    %23 = vector.load %arg10[%c0_17, %c0_18] : memref<128x128xbf16, #tpu.memory_space<vmem>>, vector<128x128xbf16>
    tpu.vector_store %arg10[%c0_17, %c0_18], %22 {strides = array<i32>} : memref<128x128xbf16, #tpu.memory_space<vmem>>, vector<128x128xbf16>,
    %c0_19 = arith.constant 0 : index
    %c0_20 = arith.constant 0 : index
    %24 = vector.load %arg8[%c0_19, %c0_20] : memref<128x128xbf16, #tpu.memory_space<vmem>>, vector<128x128xbf16>
    %25 = arith.extf %24 : vector<128x128xbf16> to vector<128x128xf32>
    %26 = arith.subf %21, %25 : vector<128x128xf32>
    %c0_21 = arith.constant 0 : index
    %c0_22 = arith.constant 0 : index
    %27 = vector.load %arg9[%c0_21, %c0_22] : memref<128x1xf32, #tpu.memory_space<vmem>>, vector<128x1xf32>
    %28 = arith.mulf %26, %26 : vector<128x128xf32>
    %29 = vector.broadcast %27 : vector<128x1xf32> to vector<128x128xf32>
    %30 = arith.mulf %28, %29 : vector<128x128xf32>
    %31 = vector.shape_cast %30 : vector<128x128xf32> to vector<1x128x128xf32>
    %cst_23 = arith.constant dense<0.000000e+00> : vector<1xf32>
    %32 = vector.multi_reduction <add>, %31, %cst_23 [1, 2] : vector<1x128x128xf32> to vector<1xf32>
    %33 = vector.shape_cast %32 : vector<1xf32> to vector<1x1x1xf32>
    %34 = vector.extract %33[0, 0, 0] : f32 from vector<1x1x1xf32>
    %35 = vector.broadcast %34 : f32 to vector<1x1xf32>
    %c0_24 = arith.constant 0 : index
    %c0_25 = arith.constant 0 : index
    %36 = vector.load %arg11[%c0_24, %c0_25] : memref<1x1xf32, #tpu.memory_space<vmem>>, vector<1x1xf32>
    tpu.vector_store %arg11[%c0_24, %c0_25], %35 {strides = array<i32>} : memref<1x1xf32, #tpu.memory_space<vmem>>, vector<1x1xf32>,
    %37 = vector.shape_cast %27 : vector<128x1xf32> to vector<1x128x1xf32>
    %cst_26 = arith.constant dense<0.000000e+00> : vector<1xf32>
    %38 = vector.multi_reduction <add>, %37, %cst_26 [1, 2] : vector<1x128x1xf32> to vector<1xf32>
    %39 = vector.shape_cast %38 : vector<1xf32> to vector<1x1x1xf32>
    %40 = vector.extract %39[0, 0, 0] : f32 from vector<1x1x1xf32>
    %41 = vector.broadcast %40 : f32 to vector<1x1xf32>
    %c0_27 = arith.constant 0 : index
    %c0_28 = arith.constant 0 : index
    %42 = vector.load %arg12[%c0_27, %c0_28] : memref<1x1xf32, #tpu.memory_space<vmem>>, vector<1x1xf32>
    tpu.vector_store %arg12[%c0_27, %c0_28], %41 {strides = array<i32>} : memref<1x1xf32, #tpu.memory_space<vmem>>, vector<1x1xf32>,
    return
  }
  func.func @transform_0(%arg0: i32) -> (i32, i32) {
    %c0_i32 = arith.constant 0 : i32
    %c0_i32_0 = arith.constant 0 : i32
    return %arg0, %c0_i32 : i32, i32
  }
  func.func @transform_1(%arg0: i32) -> (i32, i32) {
    %c0_i32 = arith.constant 0 : i32
    %c0_i32_0 = arith.constant 0 : i32
    %c0_i32_1 = arith.constant 0 : i32
    return %c0_i32, %c0_i32_0 : i32, i32
  }
  func.func @transform_2(%arg0: i32) -> (i32, i32) {
    %c0_i32 = arith.constant 0 : i32
    %c0_i32_0 = arith.constant 0 : i32
    %c0_i32_1 = arith.constant 0 : i32
    return %c0_i32, %c0_i32_0 : i32, i32
  }
  func.func @transform_3(%arg0: i32) -> (i32, i32) {
    %c0_i32 = arith.constant 0 : i32
    %c0_i32_0 = arith.constant 0 : i32
    %c0_i32_1 = arith.constant 0 : i32
    return %c0_i32, %c0_i32_0 : i32, i32
  }
  func.func @transform_4(%arg0: i32) -> (i32, i32) {
    %c0_i32 = arith.constant 0 : i32
    %c0_i32_0 = arith.constant 0 : i32
    %c0_i32_1 = arith.constant 0 : i32
    return %c0_i32, %c0_i32_0 : i32, i32
  }
  func.func @transform_5(%arg0: i32) -> (i32, i32) {
    %c0_i32 = arith.constant 0 : i32
    %c0_i32_0 = arith.constant 0 : i32
    %c0_i32_1 = arith.constant 0 : i32
    return %c0_i32, %c0_i32_0 : i32, i32
  }
  func.func @transform_6(%arg0: i32) -> (i32, i32) {
    %c0_i32 = arith.constant 0 : i32
    %c0_i32_0 = arith.constant 0 : i32
    %c0_i32_1 = arith.constant 0 : i32
    return %c0_i32, %c0_i32_0 : i32, i32
  }
  func.func @transform_7(%arg0: i32) -> (i32, i32) {
    %c0_i32 = arith.constant 0 : i32
    %c0_i32_0 = arith.constant 0 : i32
    return %arg0, %c0_i32 : i32, i32
  }
  func.func @transform_8(%arg0: i32) -> (i32, i32) {
    %c0_i32 = arith.constant 0 : i32
    %c0_i32_0 = arith.constant 0 : i32
    return %arg0, %c0_i32 : i32, i32
  }
  func.func @transform_9(%arg0: i32) -> (i32, i32) {
    %c0_i32 = arith.constant 0 : i32
    %c0_i32_0 = arith.constant 0 : i32
    return %arg0, %c0_i32 : i32, i32
  }
  func.func @transform_10(%arg0: i32) -> (i32, i32) {
    %c0_i32 = arith.constant 0 : i32
    %c0_i32_0 = arith.constant 0 : i32
    return %arg0, %c0_i32 : i32, i32
  }
  func.func @transform_11(%arg0: i32) -> (i32, i32) {
    %c0_i32 = arith.constant 0 : i32
    %c0_i32_0 = arith.constant 0 : i32
    return %arg0, %c0_i32 : i32, i32
  }
}

module attributes {stable_mosaic.version = 11 : i64} {
  func.func @_fused_mlp_kernel(%arg0: i32, %arg1: memref<128x128xbf16, #tpu.memory_space<vmem>>, %arg2: memref<128x128xbf16, #tpu.memory_space<vmem>>, %arg3: memref<1x128xf32, #tpu.memory_space<vmem>>, %arg4: memref<128x128xbf16, #tpu.memory_space<vmem>>, %arg5: memref<1x128xf32, #tpu.memory_space<vmem>>, %arg6: memref<128x128xbf16, #tpu.memory_space<vmem>>, %arg7: memref<1x128xf32, #tpu.memory_space<vmem>>, %arg8: memref<128x128xbf16, #tpu.memory_space<vmem>>, %arg9: memref<128x1xf32, #tpu.memory_space<vmem>>, %arg10: memref<128x128xbf16, #tpu.memory_space<vmem>>, %arg11: memref<1x1xf32, #tpu.memory_space<vmem>>, %arg12: memref<1x1xf32, #tpu.memory_space<vmem>>) attributes {dimension_semantics = [#tpu.dimension_semantics<parallel>], iteration_bounds = array<i64: 1>, scalar_prefetch = 0 : i64, scratch_operands = 0 : i64, tpu.core_type = #tpu.core_type<tc>, window_params = [{transform_indices = @transform_0, window_bounds = array<i64: 128, 128>}, {pipeline_mode = #tpu.pipeline_mode<synchronous>, transform_indices = @transform_1, window_bounds = array<i64: 128, 128>}, {pipeline_mode = #tpu.pipeline_mode<synchronous>, transform_indices = @transform_2, window_bounds = array<i64: 1, 128>}, {pipeline_mode = #tpu.pipeline_mode<synchronous>, transform_indices = @transform_3, window_bounds = array<i64: 128, 128>}, {pipeline_mode = #tpu.pipeline_mode<synchronous>, transform_indices = @transform_4, window_bounds = array<i64: 1, 128>}, {pipeline_mode = #tpu.pipeline_mode<synchronous>, transform_indices = @transform_5, window_bounds = array<i64: 128, 128>}, {pipeline_mode = #tpu.pipeline_mode<synchronous>, transform_indices = @transform_6, window_bounds = array<i64: 1, 128>}, {transform_indices = @transform_7, window_bounds = array<i64: 128, 128>}, {transform_indices = @transform_8, window_bounds = array<i64: 128, 1>}, {transform_indices = @transform_9, window_bounds = array<i64: 128, 128>}, {transform_indices = @transform_10, window_bounds = array<i64: 1, 1>}, {transform_indices = @transform_11, window_bounds = array<i64: 1, 1>}]} {
    %c0 = arith.constant 0 : index
    %c0_0 = arith.constant 0 : index
    %0 = vector.load %arg1[%c0, %c0_0] : memref<128x128xbf16, #tpu.memory_space<vmem>>, vector<128x128xbf16>
    %c0_1 = arith.constant 0 : index
    %c0_2 = arith.constant 0 : index
    %1 = vector.load %arg2[%c0_1, %c0_2] : memref<128x128xbf16, #tpu.memory_space<vmem>>, vector<128x128xbf16>
    %cst = arith.constant dense<0.000000e+00> : vector<128x128xf32>
    %2 = tpu.matmul %0, %1, %cst {dimension_numbers = #tpu.dot_dimension_numbers<[1], [0], [0], [1], [0, 0, 1, 1], [], []>} : vector<128x128xbf16>, vector<128x128xbf16>, vector<128x128xf32> -> vector<128x128xf32>
    %c0_3 = arith.constant 0 : index
    %c0_4 = arith.constant 0 : index
    %3 = vector.load %arg3[%c0_3, %c0_4] : memref<1x128xf32, #tpu.memory_space<vmem>>, vector<1x128xf32>
    %4 = vector.broadcast %3 : vector<1x128xf32> to vector<128x128xf32>
    %5 = arith.addf %2, %4 : vector<128x128xf32>
    %cst_5 = arith.constant 0.000000e+00 : f32
    %6 = vector.broadcast %cst_5 : f32 to vector<128x128xf32>
    %7 = arith.maximumf %5, %6 : vector<128x128xf32>
    %8 = arith.truncf %7 : vector<128x128xf32> to vector<128x128xbf16>
    %c0_6 = arith.constant 0 : index
    %c0_7 = arith.constant 0 : index
    %9 = vector.load %arg4[%c0_6, %c0_7] : memref<128x128xbf16, #tpu.memory_space<vmem>>, vector<128x128xbf16>
    %cst_8 = arith.constant dense<0.000000e+00> : vector<128x128xf32>
    %10 = tpu.matmul %8, %9, %cst_8 {dimension_numbers = #tpu.dot_dimension_numbers<[1], [0], [0], [1], [0, 0, 1, 1], [], []>} : vector<128x128xbf16>, vector<128x128xbf16>, vector<128x128xf32> -> vector<128x128xf32>
    %c0_9 = arith.constant 0 : index
    %c0_10 = arith.constant 0 : index
    %11 = vector.load %arg5[%c0_9, %c0_10] : memref<1x128xf32, #tpu.memory_space<vmem>>, vector<1x128xf32>
    %12 = vector.broadcast %11 : vector<1x128xf32> to vector<128x128xf32>
    %13 = arith.addf %10, %12 : vector<128x128xf32>
    %cst_11 = arith.constant 0.000000e+00 : f32
    %14 = vector.broadcast %cst_11 : f32 to vector<128x128xf32>
    %15 = arith.maximumf %13, %14 : vector<128x128xf32>
    %16 = arith.truncf %15 : vector<128x128xf32> to vector<128x128xbf16>
    %c0_12 = arith.constant 0 : index
    %c0_13 = arith.constant 0 : index
    %17 = vector.load %arg6[%c0_12, %c0_13] : memref<128x128xbf16, #tpu.memory_space<vmem>>, vector<128x128xbf16>
    %cst_14 = arith.constant dense<0.000000e+00> : vector<128x128xf32>
    %18 = tpu.matmul %16, %17, %cst_14 {dimension_numbers = #tpu.dot_dimension_numbers<[1], [0], [0], [1], [0, 0, 1, 1], [], []>} : vector<128x128xbf16>, vector<128x128xbf16>, vector<128x128xf32> -> vector<128x128xf32>
    %c0_15 = arith.constant 0 : index
    %c0_16 = arith.constant 0 : index
    %19 = vector.load %arg7[%c0_15, %c0_16] : memref<1x128xf32, #tpu.memory_space<vmem>>, vector<1x128xf32>
    %20 = vector.broadcast %19 : vector<1x128xf32> to vector<128x128xf32>
    %21 = arith.addf %18, %20 : vector<128x128xf32>
    %22 = arith.truncf %21 : vector<128x128xf32> to vector<128x128xbf16>
    %c0_17 = arith.constant 0 : index
    %c0_18 = arith.constant 0 : index
    %23 = vector.load %arg10[%c0_17, %c0_18] : memref<128x128xbf16, #tpu.memory_space<vmem>>, vector<128x128xbf16>
    tpu.vector_store %arg10[%c0_17, %c0_18], %22 {strides = array<i32>} : memref<128x128xbf16, #tpu.memory_space<vmem>>, vector<128x128xbf16>,
    %c0_19 = arith.constant 0 : index
    %c0_20 = arith.constant 0 : index
    %24 = vector.load %arg8[%c0_19, %c0_20] : memref<128x128xbf16, #tpu.memory_space<vmem>>, vector<128x128xbf16>
    %25 = arith.extf %24 : vector<128x128xbf16> to vector<128x128xf32>
    %26 = arith.subf %21, %25 : vector<128x128xf32>
    %c0_21 = arith.constant 0 : index
    %c0_22 = arith.constant 0 : index
    %27 = vector.load %arg9[%c0_21, %c0_22] : memref<128x1xf32, #tpu.memory_space<vmem>>, vector<128x1xf32>
    %28 = arith.mulf %26, %26 : vector<128x128xf32>
    %29 = vector.broadcast %27 : vector<128x1xf32> to vector<128x128xf32>
    %30 = arith.mulf %28, %29 : vector<128x128xf32>
    %31 = vector.shape_cast %30 : vector<128x128xf32> to vector<1x128x128xf32>
    %cst_23 = arith.constant dense<0.000000e+00> : vector<1xf32>
    %32 = vector.multi_reduction <add>, %31, %cst_23 [1, 2] : vector<1x128x128xf32> to vector<1xf32>
    %33 = vector.shape_cast %32 : vector<1xf32> to vector<1x1x1xf32>
    %34 = vector.extract %33[0, 0, 0] : f32 from vector<1x1x1xf32>
    %35 = vector.broadcast %34 : f32 to vector<1x1xf32>
    %c0_24 = arith.constant 0 : index
    %c0_25 = arith.constant 0 : index
    %36 = vector.load %arg11[%c0_24, %c0_25] : memref<1x1xf32, #tpu.memory_space<vmem>>, vector<1x1xf32>
    tpu.vector_store %arg11[%c0_24, %c0_25], %35 {strides = array<i32>} : memref<1x1xf32, #tpu.memory_space<vmem>>, vector<1x1xf32>,
    %37 = vector.shape_cast %27 : vector<128x1xf32> to vector<1x128x1xf32>
    %cst_26 = arith.constant dense<0.000000e+00> : vector<1xf32>
    %38 = vector.multi_reduction <add>, %37, %cst_26 [1, 2] : vector<1x128x1xf32> to vector<1xf32>
    %39 = vector.shape_cast %38 : vector<1xf32> to vector<1x1x1xf32>
    %40 = vector.extract %39[0, 0, 0] : f32 from vector<1x1x1xf32>
    %41 = vector.broadcast %40 : f32 to vector<1x1xf32>
    %c0_27 = arith.constant 0 : index
    %c0_28 = arith.constant 0 : index
    %42 = vector.load %arg12[%c0_27, %c0_28] : memref<1x1xf32, #tpu.memory_space<vmem>>, vector<1x1xf32>
    tpu.vector_store %arg12[%c0_27, %c0_28], %41 {strides = array<i32>} : memref<1x1xf32, #tpu.memory_space<vmem>>, vector<1x1xf32>,
    return
  }
  func.func @transform_0(%arg0: i32) -> (i32, i32) {
    %c0_i32 = arith.constant 0 : i32
    %c0_i32_0 = arith.constant 0 : i32
    return %arg0, %c0_i32 : i32, i32
  }
  func.func @transform_1(%arg0: i32) -> (i32, i32) {
    %c0_i32 = arith.constant 0 : i32
    %c0_i32_0 = arith.constant 0 : i32
    %c0_i32_1 = arith.constant 0 : i32
    return %c0_i32, %c0_i32_0 : i32, i32
  }
  func.func @transform_2(%arg0: i32) -> (i32, i32) {
    %c0_i32 = arith.constant 0 : i32
    %c0_i32_0 = arith.constant 0 : i32
    %c0_i32_1 = arith.constant 0 : i32
    return %c0_i32, %c0_i32_0 : i32, i32
  }
  func.func @transform_3(%arg0: i32) -> (i32, i32) {
    %c0_i32 = arith.constant 0 : i32
    %c0_i32_0 = arith.constant 0 : i32
    %c0_i32_1 = arith.constant 0 : i32
    return %c0_i32, %c0_i32_0 : i32, i32
  }
  func.func @transform_4(%arg0: i32) -> (i32, i32) {
    %c0_i32 = arith.constant 0 : i32
    %c0_i32_0 = arith.constant 0 : i32
    %c0_i32_1 = arith.constant 0 : i32
    return %c0_i32, %c0_i32_0 : i32, i32
  }
  func.func @transform_5(%arg0: i32) -> (i32, i32) {
    %c0_i32 = arith.constant 0 : i32
    %c0_i32_0 = arith.constant 0 : i32
    %c0_i32_1 = arith.constant 0 : i32
    return %c0_i32, %c0_i32_0 : i32, i32
  }
  func.func @transform_6(%arg0: i32) -> (i32, i32) {
    %c0_i32 = arith.constant 0 : i32
    %c0_i32_0 = arith.constant 0 : i32
    %c0_i32_1 = arith.constant 0 : i32
    return %c0_i32, %c0_i32_0 : i32, i32
  }
  func.func @transform_7(%arg0: i32) -> (i32, i32) {
    %c0_i32 = arith.constant 0 : i32
    %c0_i32_0 = arith.constant 0 : i32
    return %arg0, %c0_i32 : i32, i32
  }
  func.func @transform_8(%arg0: i32) -> (i32, i32) {
    %c0_i32 = arith.constant 0 : i32
    %c0_i32_0 = arith.constant 0 : i32
    return %arg0, %c0_i32 : i32, i32
  }
  func.func @transform_9(%arg0: i32) -> (i32, i32) {
    %c0_i32 = arith.constant 0 : i32
    %c0_i32_0 = arith.constant 0 : i32
    return %arg0, %c0_i32 : i32, i32
  }
  func.func @transform_10(%arg0: i32) -> (i32, i32) {
    %c0_i32 = arith.constant 0 : i32
    %c0_i32_0 = arith.constant 0 : i32
    return %arg0, %c0_i32 : i32, i32
  }
  func.func @transform_11(%arg0: i32) -> (i32, i32) {
    %c0_i32 = arith.constant 0 : i32
    %c0_i32_0 = arith.constant 0 : i32
    return %arg0, %c0_i32 : i32, i32
  }
}

</mosaic_0001>

<bundles_post_ra>
// kernel: _mlp_forward_core.1
= control target key start
LH: loop header
LB: loop body
LE: loop exit
PB: predicated region body
PF: predicated region fallthrough
CT: control target
= control target key end

     0   :  { %17 = vsyncpa [#allocation3], 0  ;;  %s1513_s0 = inlined_call_operand.vmem [shape: bf16[128,128], index: 0, kind: input, shape index: {}]   ;;  %s1514_s1 = inlined_call_operand.vmem [shape: bf16[128,128], index: 1, kind: input, shape index: {}]   ;;  %s1515_s2 = inlined_call_operand.vmem [shape: f32[1,128], index: 2, kind: input, shape index: {}]   ;;  %s1516_s3 = inlined_call_operand.vmem [shape: bf16[128,128], index: 3, kind: input, shape index: {}]   ;;  %s1517_s4 = inlined_call_operand.vmem [shape: f32[1,128], index: 4, kind: input, shape index: {}]   ;;  %s1518_s5 = inlined_call_operand.vmem [shape: bf16[128,128], index: 5, kind: input, shape index: {}]   ;;  %s1519_s6 = inlined_call_operand.vmem [shape: f32[1,128], index: 6, kind: input, shape index: {}]   ;;  %s1520_s7 = inlined_call_operand.vmem [shape: bf16[128,128], index: 7, kind: input, shape index: {}]   ;;  %s1521_s8 = inlined_call_operand.vmem [shape: f32[128,1], index: 8, kind: input, shape index: {}]   ;;  %s1522_s9 = inlined_call_operand.vmem [shape: bf16[128,128], index: 9, kind: output, shape index: {0}]   ;;  %s1523_s10 = inlined_call_operand.hbm [shape: f32[1,1], index: 10, kind: output, shape index: {1}]   ;;  %s1524_s11 = inlined_call_operand.hbm [shape: f32[1,1], index: 11, kind: output, shape index: {2}]  }
   0x1   :  { %v957_v0 = vld [vmem:[%s1514_s1 + $0x38] sm:$0xff]  ;;  %v956_v1 = vld [vmem:[%s1514_s1 + $0x30] sm:$0xff] }
   0x2   :  { %169 = vmatpush.bf16.msra.mxu0 %v957_v0  ;;  %1060 = vmatpush.bf16.msra.mxu3 %v957_v0 }
   0x3   :  { %18 = vsyncpa [#allocation5], 0  ;;  %v955_v2 = vld [vmem:[%s1514_s1 + $0x28] sm:$0xff]  ;;  %v954_v3 = vld [vmem:[%s1514_s1 + $0x20] sm:$0xff]  ;;  %vm735_vm0 = vcmask 7168   ;;  %s787_s12 = sshll.u32 %s1523_s10, 4  ;;  %s788_s12 = int_to_ptr.hbm [resolvable:$true] %s787_s12 }
   0x4   :  { %v953_v4 = vld [vmem:[%s1514_s1 + $0x18] sm:$0xff]  ;;  %v952_v5 = vld [vmem:[%s1514_s1 + $0x10] sm:$0xff]  ;;  %v951_v6 = vld [vmem:[%s1514_s1 + $0x8] sm:$0xff]  ;;  %s1151_s13 = smov [#allocation4]   ;;  %s798_s17 = sshll.u32 %s1524_s11, 4  ;;  %vm733_vm1 = vcmask 0   ;;  %s799_s17 = int_to_ptr.hbm [resolvable:$true] %s798_s17 }
   0x5   :  { %v950_v7 = vld [vmem:[%s1514_s1] sm:$0xff]  ;;  %v948_v9 = vld [vmem:[%s1513_s0 + $0x30] sm:$0xff]  ;;  %v943_v10 = vld [vmem:[%s1513_s0 + $0x8] sm:$0xff]  ;;  %s796_s14 = sshll.u32 %s1151_s13, 4  ;;  %s797_s14 = int_to_ptr.vmem [resolvable:$true] %s796_s14 }
   0x6   :  { %170 = vmatpush.bf16.msra.mxu0 %v956_v1  ;;  %1061 = vmatpush.bf16.msra.mxu3 %v956_v1  ;;  %v942_v8 = vld [vmem:[%s1513_s0] sm:$0xff]  ;;  %v949_v11 = vld [vmem:[%s1513_s0 + $0x38] sm:$0xff]  ;;  %v944_v12 = vld [vmem:[%s1513_s0 + $0x10] sm:$0xff] }
   0x7   :  { %v945_v13 = vld [vmem:[%s1513_s0 + $0x18] sm:$0xff]  ;;  %v964_v15 = vld [vmem:[%s1516_s3 + $0x30] sm:$0xff]  ;;  %v963_v16 = vld [vmem:[%s1516_s3 + $0x28] sm:$0xff] }
   0x8   :  { %v965_v14 = vld [vmem:[%s1516_s3 + $0x38] sm:$0xff]  ;;  %v962_v17 = vld [vmem:[%s1516_s3 + $0x20] sm:$0xff]  ;;  %v947_v19 = vld [vmem:[%s1513_s0 + $0x28] sm:$0xff] }
   0x9   :  { %310 = vmatpush.bf16.msra.mxu1 %v965_v14  ;;  %v946_v18 = vld [vmem:[%s1513_s0 + $0x20] sm:$0xff]  ;;  %v961_v20 = vld [vmem:[%s1516_s3 + $0x18] sm:$0xff]  ;;  %v960_v21 = vld [vmem:[%s1516_s3 + $0x10] sm:$0xff] }
   0xa   :  { %171 = vmatpush.bf16.msra.mxu0 %v955_v2  ;;  %1062 = vmatpush.bf16.msra.mxu3 %v955_v2  ;;  %v959_v22 = vld [vmem:[%s1516_s3 + $0x8] sm:$0xff]  ;;  %v958_v23 = vld [vmem:[%s1516_s3] sm:$0xff] }
   0xb   :  { %v1287_v25 = vld [vmem:[%s1515_s2] ss:$0 sm:$0xff] }
   0xd   :  { %311 = vmatpush.bf16.msra.mxu1 %v964_v15 }
   0xe   :  { %172 = vmatpush.bf16.msra.mxu0 %v954_v3  ;;  %1063 = vmatpush.bf16.msra.mxu3 %v954_v3  ;;  %v973_v3 = vld [vmem:[%s1518_s5 + $0x38] sm:$0xff] }
   0xf   :  { %451 = vmatpush.bf16.msra.mxu2 %v973_v3 }
  0x11   :  { %312 = vmatpush.bf16.msra.mxu1 %v963_v16 }
  0x12   :  { %173 = vmatpush.bf16.msra.mxu0 %v953_v4  ;;  %1064 = vmatpush.bf16.msra.mxu3 %v953_v4 }
  0x15   :  { %313 = vmatpush.bf16.msra.mxu1 %v962_v17 }
  0x16   :  { %174 = vmatpush.bf16.msra.mxu0 %v952_v5  ;;  %1065 = vmatpush.bf16.msra.mxu3 %v952_v5  ;;  %v972_v5 = vld [vmem:[%s1518_s5 + $0x30] sm:$0xff] }
  0x17   :  { %452 = vmatpush.bf16.msra.mxu2 %v972_v5 }
  0x19   :  { %314 = vmatpush.bf16.msra.mxu1 %v961_v20 }
  0x1a   :  { %175 = vmatpush.bf16.msra.mxu0 %v951_v6  ;;  %1066 = vmatpush.bf16.msra.mxu3 %v951_v6  ;;  %v971_v6 = vld [vmem:[%s1518_s5 + $0x28] sm:$0xff] }
  0x1b   :  { %453 = vmatpush.bf16.msra.mxu2 %v971_v6 }
  0x1d   :  { %315 = vmatpush.bf16.msra.mxu1 %v960_v21 }
  0x1e   :  { %176 = vmatpush.bf16.msra.mxu0 %v950_v7  ;;  %1067 = vmatpush.bf16.msra.mxu3 %v950_v7 }
  0x21   :  { %177 = vmatmul.bf16.vlgmr.msra.gmra.mxu0 %v942_v8  ;;  %207 = vmatmul.bf16.vlgmr.msra.gmra.mxu3 %v948_v9 }
  0x22   :  { %1068 = vmatpush.bf16.msrb.mxu3 %v965_v14  ;;  %316 = vmatpush.bf16.msra.mxu1 %v959_v22 }
  0x26   :  { %1069 = vmatpush.bf16.msrb.mxu3 %v964_v15  ;;  %317 = vmatpush.bf16.msra.mxu1 %v958_v23 }
  0x2a   :  { %1070 = vmatpush.bf16.msrb.mxu3 %v963_v16 }
  0x2e   :  { %1071 = vmatpush.bf16.msrb.mxu3 %v962_v17 }
  0x31   :  { %182 = vmatmul.bf16.gmra.mxu0 %v943_v10  ;;  %212 = vmatmul.bf16.gmra.mxu3 %v949_v11  ;;  %v970_v10 = vld [vmem:[%s1518_s5 + $0x20] sm:$0xff] }
  0x32   :  { %1072 = vmatpush.bf16.msrb.mxu3 %v961_v20  ;;  %454 = vmatpush.bf16.msra.mxu2 %v970_v10 }
  0x36   :  { %1073 = vmatpush.bf16.msrb.mxu3 %v960_v21  ;;  %v969_v21 = vld [vmem:[%s1518_s5 + $0x18] sm:$0xff] }
  0x37   :  { %455 = vmatpush.bf16.msra.mxu2 %v969_v21 }
  0x3a   :  { %1074 = vmatpush.bf16.msrb.mxu3 %v959_v22  ;;  %v968_v22 = vld [vmem:[%s1518_s5 + $0x10] sm:$0xff] }
  0x3b   :  { %456 = vmatpush.bf16.msra.mxu2 %v968_v22 }
  0x3e   :  { %1075 = vmatpush.bf16.msrb.mxu3 %v958_v23  ;;  %v967_v23 = vld [vmem:[%s1518_s5 + $0x8] sm:$0xff] }
  0x3f   :  { %457 = vmatpush.bf16.msra.mxu2 %v967_v23 }
  0x41   :  { %187 = vmatmul.bf16.gmra.mxu0 %v944_v12 }
  0x42   :  { %1076 = vmatpush.bf16.msra.mxu3 %v973_v3 }
  0x46   :  { %1077 = vmatpush.bf16.msra.mxu3 %v972_v5 }
  0x4a   :  { %1078 = vmatpush.bf16.msra.mxu3 %v971_v6 }
  0x4e   :  { %1079 = vmatpush.bf16.msra.mxu3 %v970_v10  ;;  %v589_v10 = vld [vmem:[%s1521_s8 + $0x48] sm:$0xff] }
  0x51   :  { %192 = vmatmul.bf16.gmra.mxu0 %v945_v13 }
  0x52   :  { %1080 = vmatpush.bf16.msra.mxu3 %v969_v21  ;;  %v1383_v21 = vld [vmem:[%s1521_s8 + $0x68] sm:$0xff] }
  0x56   :  { %1081 = vmatpush.bf16.msra.mxu3 %v968_v22  ;;  %v1388_v22 = vld [vmem:[%s1521_s8 + $0x78] sm:$0xff] }
  0x5a   :  { %1082 = vmatpush.bf16.msra.mxu3 %v967_v23 }
  0x61   :  { %197 = vmatmul.bf16.gmra.mxu0 %v946_v18 }
  0x71   :  { %202 = vmatmul.bf16.gmra.mxu0 %v947_v19 }
  0x9e   :  { %v178_v24 = vpop.f32.mrf.mxu0 }
  0x9f   :  { %v179_v27 = vadd.f32 %v1287_v25, %v178_v24  ;;  %v966_v24 = vld [vmem:[%s1518_s5] sm:$0xff] }
  0xa0   :  { %458 = vmatpush.bf16.msra.mxu2 %v966_v24  ;;  %1083 = vmatpush.bf16.msra.mxu3 %v966_v24 }
  0xa1   :  { %v218_v30 = vmax.f32 %v179_v27, 0.0  ;;  %v580_v27 = vld [vmem:[%s1521_s8] sm:$0xff] }
  0xa4   :  { %v208_v26 = vpop.f32.mrf.mxu3 }
  0xa5   :  { %v209_v32 = vadd.f32 %v1287_v25, %v208_v26  ;;  %v1332_v26 = vld [vmem:[%s1517_s4] ss:$0 sm:$0xff] }
  0xa6   :  { %v180_v28 = vpop.f32.mrf.mxu0 }
  0xa7   :  { %v181_v29 = vadd.f32 %v1287_v25, %v180_v28  ;;  %v230_v35 = vmax.f32 %v209_v32, 0.0  ;;  %v1149_v28 = vmov 0   ;;  %v736_v32 = vsel %vm735_vm0, %v580_v27, 0.0 }
  0xa8   :  { %1091 = vset.pattern.permute.xlu0 %v1149_v28  ;;  %1092 = vset.pattern.permute.xlu1 %v1149_v28 }
  0xa9   :  { %v219_v31 = vmax.f32 %v181_v29, 0.0  ;;  %614 = vperm.xlu0 %1091, %v580_v27   ;;  %1093 = vset.pattern.permute.xlu2 %v1149_v28  ;;  %v585_v27 = vld [vmem:[%s1521_s8 + $0x28] sm:$0xff] }
  0xab   :  { %v234_v33 = vpack.c.bf16 %v219_v31, %v218_v30 }
  0xac   :  { %v210_v34 = vpop.f32.mrf.mxu3 }
  0xad   :  { %318 = vmatmul.bf16.vlgmr.msra.gmra.mxu1 %v234_v33  ;;  %v211_v36 = vadd.f32 %v1287_v25, %v210_v34 }
  0xae   :  { %v183_v37 = vpop.f32.mrf.mxu0 }
  0xaf   :  { %v231_v38 = vmax.f32 %v211_v36, 0.0  ;;  %v184_v41 = vadd.f32 %v1287_v25, %v183_v37 }
  0xb1   :  { %v240_v39 = vpack.c.bf16 %v231_v38, %v230_v35  ;;  %v220_v44 = vmax.f32 %v184_v41, 0.0  ;;  %v581_v35 = vld [vmem:[%s1521_s8 + $0x8] sm:$0xff] }
  0xb2   :  { %v737_v37 = vsel %vm735_vm0, %v581_v35, 0.0  ;;  %619 = vperm.xlu0 %1091, %v581_v35  }
  0xb3   :  { %348 = vmatmul.bf16.vlgmr.msrb.gmra.mxu3 %v240_v39  ;;  %v738_v39 = vadd.f32 %v737_v37, %v736_v32  ;;  %v753_v37 = vsel %vm735_vm0, %v589_v10, 0.0 }
  0xb4   :  { %v213_v40 = vpop.f32.mrf.mxu3 }
  0xb5   :  { %v214_v46 = vadd.f32 %v1287_v25, %v213_v40 }
  0xb6   :  { %v185_v42 = vpop.f32.mrf.mxu0 }
  0xb7   :  { %v186_v43 = vadd.f32 %v1287_v25, %v185_v42  ;;  %v232_v49 = vmax.f32 %v214_v46, 0.0  ;;  %v582_v42 = vld [vmem:[%s1521_s8 + $0x10] sm:$0xff] }
  0xb8   :  { %624 = vperm.xlu1 %1092, %v582_v42  }
  0xb9   :  { %v221_v45 = vmax.f32 %v186_v43, 0.0 }
  0xbb   :  { %v235_v47 = vpack.c.bf16 %v221_v45, %v220_v44  ;;  %v739_v44 = vsel %vm735_vm0, %v582_v42, 0.0 }
  0xbc   :  { %v215_v48 = vpop.f32.mrf.mxu3 }
  0xbd   :  { %323 = vmatmul.bf16.gmra.mxu1 %v235_v47  ;;  %v216_v50 = vadd.f32 %v1287_v25, %v215_v48  ;;  %v740_v47 = vadd.f32 %v739_v44, %v738_v39  ;;  %v591_v44 = vld [vmem:[%s1521_s8 + $0x58] sm:$0xff] }
  0xbe   :  { %v188_v51 = vpop.f32.mrf.mxu0 }
  0xbf   :  { %v233_v52 = vmax.f32 %v216_v50, 0.0  ;;  %v189_v54 = vadd.f32 %v1287_v25, %v188_v51 }
  0xc1   :  { %v241_v53 = vpack.c.bf16 %v233_v52, %v232_v49  ;;  %v222_v57 = vmax.f32 %v189_v54, 0.0 }
  0xc3   :  { %353 = vmatmul.bf16.gmra.mxu3 %v241_v53 }
  0xc6   :  { %v190_v55 = vpop.f32.mrf.mxu0 }
  0xc7   :  { %v191_v56 = vadd.f32 %v1287_v25, %v190_v55  ;;  %v583_v55 = vld [vmem:[%s1521_s8 + $0x18] sm:$0xff] }
  0xc8   :  { %629 = vperm.xlu1 %1092, %v583_v55  }
  0xc9   :  { %v223_v58 = vmax.f32 %v191_v56, 0.0 }
  0xcb   :  { %v236_v59 = vpack.c.bf16 %v223_v58, %v222_v57  ;;  %v741_v57 = vsel %vm735_vm0, %v583_v55, 0.0 }
  0xcd   :  { %328 = vmatmul.bf16.gmra.mxu1 %v236_v59  ;;  %v742_v59 = vadd.f32 %v741_v57, %v740_v47  ;;  %v594_v57 = vld [vmem:[%s1521_s8 + $0x70] sm:$0xff] }
  0xce   :  { %v193_v60 = vpop.f32.mrf.mxu0 }
  0xcf   :  { %v194_v61 = vadd.f32 %v1287_v25, %v193_v60 }
  0xd1   :  { %v224_v0 = vmax.f32 %v194_v61, 0.0 }
  0xd6   :  { %v195_v62 = vpop.f32.mrf.mxu0 }
  0xd7   :  { %v196_v63 = vadd.f32 %v1287_v25, %v195_v62  ;;  %v586_v62 = vld [vmem:[%s1521_s8 + $0x30] sm:$0xff] }
  0xd8   :  { %644 = vperm.xlu0 %1091, %v586_v62  }
  0xd9   :  { %v225_v1 = vmax.f32 %v196_v63, 0.0 }
  0xdb   :  { %v237_v2 = vpack.c.bf16 %v225_v1, %v224_v0 }
  0xdd   :  { %333 = vmatmul.bf16.gmra.mxu1 %v237_v2 }
  0xde   :  { %v198_v4 = vpop.f32.mrf.mxu0 }
  0xdf   :  { %v199_v7 = vadd.f32 %v1287_v25, %v198_v4 }
  0xe0   :  { %659 = vperm.xlu0 %1091, %v589_v10  }
  0xe1   :  { %v226_v11 = vmax.f32 %v199_v7, 0.0 }
  0xe6   :  { %v200_v8 = vpop.f32.mrf.mxu0 }
  0xe7   :  { %v201_v9 = vadd.f32 %v1287_v25, %v200_v8 }
  0xe9   :  { %v227_v12 = vmax.f32 %v201_v9, 0.0  ;;  %v587_v9 = vld [vmem:[%s1521_s8 + $0x38] sm:$0xff] }
  0xea   :  { %649 = vperm.xlu1 %1092, %v587_v9   ;;  %v749_v32 = vsel %vm735_vm0, %v587_v9, 0.0 }
  0xeb   :  { %v238_v13 = vpack.c.bf16 %v227_v12, %v226_v11 }
  0xed   :  { %338 = vmatmul.bf16.gmra.mxu1 %v238_v13  ;;  %v590_v13 = vld [vmem:[%s1521_s8 + $0x50] sm:$0xff] }
  0xee   :  { %v203_v14 = vpop.f32.mrf.mxu0 }
  0xef   :  { %v204_v15 = vadd.f32 %v1287_v25, %v203_v14  ;;  %v592_v14 = vld [vmem:[%s1521_s8 + $0x60] sm:$0xff] }
  0xf0   :  { %674 = vperm.xlu0 %1091, %v592_v14  }
  0xf1   :  { %v228_v18 = vmax.f32 %v204_v15, 0.0 }
  0xf2   :  { %664 = vperm.xlu1 %1092, %v590_v13  }
  0xf6   :  { %v205_v16 = vpop.f32.mrf.mxu0 }
  0xf7   :  { %v206_v17 = vadd.f32 %v1287_v25, %v205_v16 }
  0xf8   :  { %689 = vperm.xlu0 %1091, %v1388_v22  }
  0xf9   :  { %v229_v19 = vmax.f32 %v206_v17, 0.0 }
  0xfa   :  { %679 = vperm.xlu1 %1092, %v1383_v21  }
  0xfb   :  { %v239_v20 = vpack.c.bf16 %v229_v19, %v228_v18 }
  0xfd   :  { %343 = vmatmul.bf16.gmra.mxu1 %v239_v20  ;;  %v584_v20 = vld [vmem:[%s1521_s8 + $0x20] sm:$0xff] }
  0xfe   :  { %634 = vperm.xlu2 %1093, %v584_v20   ;;  %v743_v23 = vsel %vm735_vm0, %v584_v20, 0.0 }
 0x106   :  { %639 = vperm.xlu2 %1093, %v585_v27  }
 0x12a   :  { %v319_v25 = vpop.f32.mrf.mxu1 }
 0x12b   :  { %v320_v29 = vadd.f32 %v1332_v26, %v319_v25  ;;  %v744_v25 = vadd.f32 %v743_v23, %v742_v59 }
 0x12d   :  { %v359_v33 = vmax.f32 %v320_v29, 0.0  ;;  %v747_v29 = vsel %vm735_vm0, %v586_v62, 0.0  ;;  %v1420_v62 = vld [vmem:[%s1519_s6] ss:$0 sm:$0xff] }
 0x132   :  { %v321_v30 = vpop.f32.mrf.mxu1 }
 0x133   :  { %v322_v31 = vadd.f32 %v1332_v26, %v321_v30  ;;  %v745_v30 = vsel %vm735_vm0, %v585_v27, 0.0 }
 0x135   :  { %v360_v34 = vmax.f32 %v322_v31, 0.0  ;;  %v746_v31 = vadd.f32 %v745_v30, %v744_v25  ;;  %v615_v25 = vpop.permute.xlu0 %614  ;;  %v625_v30 = vpop.permute.xlu1 %624 }
 0x136   :  { %v349_v36 = vpop.f32.mrf.mxu3 }
 0x137   :  { %v375_v38 = vpack.c.bf16 %v360_v34, %v359_v33  ;;  %v350_v41 = vadd.f32 %v1332_v26, %v349_v36  ;;  %v748_v33 = vadd.f32 %v747_v29, %v746_v31  ;;  %v588_v34 = vld [vmem:[%s1521_s8 + $0x40] sm:$0xff] }
 0x138   :  { %v751_v35 = vsel %vm735_vm0, %v588_v34, 0.0  ;;  %654 = vperm.xlu2 %1093, %v588_v34  }
 0x139   :  { %459 = vmatmul.bf16.vlgmr.msra.gmra.mxu2 %v375_v38  ;;  %v371_v45 = vmax.f32 %v350_v41, 0.0  ;;  %v750_v36 = vadd.f32 %v749_v32, %v748_v33  ;;  %v755_v41 = vsel %vm735_vm0, %v590_v13, 0.0  ;;  %v1015_v32 = vld [vmem:[%s1520_s7] sm:$0xff]   ;;  %v1053_v33 = vld [vmem:[%s1520_s7 + $0x8] sm:$0xff]  }
 0x13a   :  { %v324_v40 = vpop.f32.mrf.mxu1 }
 0x13b   :  { %v325_v48 = vadd.f32 %v1332_v26, %v324_v40  ;;  %v752_v39 = vadd.f32 %v751_v35, %v750_v36  ;;  %v761_v35 = vsel %vm735_vm0, %v1383_v21, 0.0  ;;  %v1017_v36 = vunpack.c.h.bf16 %v1015_v32 }
 0x13c   :  { %v765_v21 = vsel %vm735_vm0, %v1388_v22, 0.0 }
 0x13d   :  { %v361_v53 = vmax.f32 %v325_v48, 0.0 }
 0x13e   :  { %v351_v43 = vpop.f32.mrf.mxu3 }
 0x13f   :  { %v352_v46 = vadd.f32 %v1332_v26, %v351_v43  ;;  %v754_v43 = vadd.f32 %v753_v37, %v752_v39  ;;  %v763_v37 = vsel %vm735_vm0, %v594_v57, 0.0  ;;  %v620_v39 = vpop.permute.xlu0 %619 }
 0x140   :  { %669 = vperm.xlu2 %1093, %v591_v44  }
 0x141   :  { %v372_v49 = vmax.f32 %v352_v46, 0.0  ;;  %v756_v48 = vadd.f32 %v755_v41, %v754_v43  ;;  %v1021_v43 = vunpack.c.h.bf16 %v1053_v33 }
 0x142   :  { %v326_v50 = vpop.f32.mrf.mxu1 }
 0x143   :  { %v327_v51 = vadd.f32 %v1332_v26, %v326_v50  ;;  %v381_v52 = vpack.c.bf16 %v372_v49, %v371_v45  ;;  %v757_v45 = vsel %vm735_vm0, %v591_v44, 0.0  ;;  %v759_v49 = vsel %vm735_vm0, %v592_v14, 0.0  ;;  %v1054_v44 = vld [vmem:[%s1520_s7 + $0x10] sm:$0xff]  }
 0x145   :  { %v362_v54 = vmax.f32 %v327_v51, 0.0  ;;  %489 = vmatmul.bf16.vlgmr.msra.gmra.mxu3 %v381_v52  ;;  %v758_v51 = vadd.f32 %v757_v45, %v756_v48 }
 0x146   :  { %v354_v56 = vpop.f32.mrf.mxu3 }
 0x147   :  { %v376_v58 = vpack.c.bf16 %v362_v54, %v361_v53  ;;  %v355_v61 = vadd.f32 %v1332_v26, %v354_v56  ;;  %v760_v52 = vadd.f32 %v759_v49, %v758_v51  ;;  %v1024_v49 = vunpack.c.l.bf16 %v1054_v44 }
 0x148   :  { %684 = vperm.xlu2 %1093, %v594_v57  }
 0x149   :  { %464 = vmatmul.bf16.gmra.mxu2 %v376_v58  ;;  %v373_v0 = vmax.f32 %v355_v61, 0.0  ;;  %v762_v41 = vadd.f32 %v761_v35, %v760_v52  ;;  %v1055_v52 = vld [vmem:[%s1520_s7 + $0x18] sm:$0xff]  }
 0x14a   :  { %v329_v60 = vpop.f32.mrf.mxu1 }
 0x14b   :  { %v330_v2 = vadd.f32 %v1332_v26, %v329_v60 }
 0x14d   :  { %v363_v7 = vmax.f32 %v330_v2, 0.0 }
 0x14e   :  { %v356_v63 = vpop.f32.mrf.mxu3 }
 0x14f   :  { %v357_v1 = vadd.f32 %v1332_v26, %v356_v63 }
 0x151   :  { %v374_v3 = vmax.f32 %v357_v1, 0.0 }
 0x152   :  { %v331_v4 = vpop.f32.mrf.mxu1 }
 0x153   :  { %v332_v5 = vadd.f32 %v1332_v26, %v331_v4  ;;  %v382_v6 = vpack.c.bf16 %v374_v3, %v373_v0 }
 0x155   :  { %v364_v8 = vmax.f32 %v332_v5, 0.0  ;;  %494 = vmatmul.bf16.gmra.mxu3 %v382_v6 }
 0x157   :  { %v377_v11 = vpack.c.bf16 %v364_v8, %v363_v7 }
 0x158   :  { %v635_v31 = vpop.permute.xlu2 %634 }
 0x159   :  { %469 = vmatmul.bf16.gmra.mxu2 %v377_v11 }
 0x15a   :  { %v334_v12 = vpop.f32.mrf.mxu1 }
 0x15b   :  { %v335_v15 = vadd.f32 %v1332_v26, %v334_v12 }
 0x15d   :  { %v365_v18 = vmax.f32 %v335_v15, 0.0 }
 0x162   :  { %v336_v16 = vpop.f32.mrf.mxu1 }
 0x163   :  { %v337_v17 = vadd.f32 %v1332_v26, %v336_v16 }
 0x165   :  { %v366_v19 = vmax.f32 %v337_v17, 0.0 }
 0x167   :  { %v378_v24 = vpack.c.bf16 %v366_v19, %v365_v18 }
 0x169   :  { %474 = vmatmul.bf16.gmra.mxu2 %v378_v24 }
 0x16a   :  { %v339_v28 = vpop.f32.mrf.mxu1 }
 0x16b   :  { %v340_v38 = vadd.f32 %v1332_v26, %v339_v28 }
 0x16d   :  { %v367_v46 = vmax.f32 %v340_v38, 0.0  ;;  %v1016_v38 = vunpack.c.l.bf16 %v1015_v32 }
 0x172   :  { %v341_v40 = vpop.f32.mrf.mxu1 }
 0x173   :  { %v342_v42 = vadd.f32 %v1332_v26, %v341_v40  ;;  %v1020_v40 = vunpack.c.l.bf16 %v1053_v33 }
 0x175   :  { %v368_v47 = vmax.f32 %v342_v42, 0.0 }
 0x177   :  { %v379_v50 = vpack.c.bf16 %v368_v47, %v367_v46  ;;  %v764_v46 = vadd.f32 %v763_v37, %v762_v41 }
 0x179   :  { %479 = vmatmul.bf16.gmra.mxu2 %v379_v50  ;;  %v766_v50 = vadd.f32 %v765_v21, %v764_v46 }
 0x17a   :  { %v344_v53 = vpop.f32.mrf.mxu1 }
 0x17b   :  { %v345_v54 = vadd.f32 %v1332_v26, %v344_v53  ;;  %767 = vadd.xlane.f32.xlu2 %v766_v50 }
 0x17d   :  { %v369_v58 = vmax.f32 %v345_v54, 0.0  ;;  %v630_v54 = vpop.permute.xlu1 %629 }
 0x182   :  { %v346_v55 = vpop.f32.mrf.mxu1 }
 0x183   :  { %v347_v56 = vadd.f32 %v1332_v26, %v346_v55  ;;  %v640_v55 = vpop.permute.xlu2 %639 }
 0x185   :  { %v370_v59 = vmax.f32 %v347_v56, 0.0  ;;  %v1025_v56 = vunpack.c.h.bf16 %v1054_v44 }
 0x187   :  { %v380_v60 = vpack.c.bf16 %v370_v59, %v369_v58  ;;  %v645_v59 = vpop.permute.xlu0 %644 }
 0x189   :  { %484 = vmatmul.bf16.gmra.mxu2 %v380_v60 }
 0x1bc   :  { %v460_v61 = vpop.f32.mrf.mxu2 }
 0x1bd   :  { %v461_v0 = vadd.f32 %v1420_v62, %v460_v61  ;;  %v1028_v61 = vunpack.c.l.bf16 %v1055_v52 }
 0x1bf   :  { %v564_v47 = vsub.f32 %v461_v0, %v1016_v38 }
 0x1c1   :  { %v596_v57 = vmul.f32 %v564_v47, %v564_v47 }
 0x1c4   :  { %v462_v63 = vpop.f32.mrf.mxu2 }
 0x1c5   :  { %v463_v26 = vadd.f32 %v1420_v62, %v462_v63 }
 0x1c7   :  { %v977_v1 = vpack.c.bf16 %v463_v26, %v461_v0  ;;  %v565_v42 = vsub.f32 %v463_v26, %v1017_v36  ;;  %v1056_v0 = vld [vmem:[%s1520_s7 + $0x20] sm:$0xff]   ;;  %v1058_v36 = vld [vmem:[%s1520_s7 + $0x30] sm:$0xff]  }
 0x1c8   :  { %v490_v2 = vpop.f32.mrf.mxu3  ;;  %v1041_v21 = vunpack.c.h.bf16 %v1058_v36 }
 0x1c9   :  { %978 = vst [vmem:[%s1522_s9] sm:$0xff] %v977_v1   ;;  %v1428_v4 = vadd.f32 %v1420_v62, %v490_v2  ;;  %v597_v51 = vmul.f32 %v565_v42, %v565_v42  ;;  %v1029_v2 = vunpack.c.h.bf16 %v1055_v52 }
 0x1cb   :  { %v693_v22 = vmul.f32 %v620_v39, %v597_v51 }
 0x1cc   :  { %v465_v3 = vpop.f32.mrf.mxu2 }
 0x1cd   :  { %v466_v9 = vadd.f32 %v1420_v62, %v465_v3 }
 0x1cf   :  { %v566_v48 = vsub.f32 %v466_v9, %v1020_v40 }
 0x1d0   :  { %v492_v5 = vpop.f32.mrf.mxu3 }
 0x1d1   :  { %v1431_v6 = vadd.f32 %v1420_v62, %v492_v5  ;;  %v598_v58 = vmul.f32 %v566_v48, %v566_v48 }
 0x1d3   :  { %v1007_v7 = vpack.c.bf16 %v1431_v6, %v1428_v4 }
 0x1d4   :  { %v467_v8 = vpop.f32.mrf.mxu2 }
 0x1d5   :  { %v468_v10 = vadd.f32 %v1420_v62, %v467_v8  ;;  %1051 = vst [vmem:[%s1522_s9 + $0x30] sm:$0xff] %v1007_v7   ;;  %v692_v7 = vmul.f32 %v615_v25, %v596_v57  ;;  %v694_v8 = vmul.f32 %v625_v30, %v598_v58  ;;  %v655_v25 = vpop.permute.xlu2 %654 }
 0x1d7   :  { %v982_v11 = vpack.c.bf16 %v468_v10, %v466_v9  ;;  %v567_v53 = vsub.f32 %v468_v10, %v1021_v43 }
 0x1d8   :  { %v495_v12 = vpop.f32.mrf.mxu3 }
 0x1d9   :  { %1046 = vst [vmem:[%s1522_s9 + $0x8] sm:$0xff] %v982_v11   ;;  %v1444_v15 = vadd.f32 %v1420_v62, %v495_v12  ;;  %v599_v63 = vmul.f32 %v567_v53, %v567_v53  ;;  %v1032_v11 = vunpack.c.l.bf16 %v1056_v0 }
 0x1dc   :  { %v470_v13 = vpop.f32.mrf.mxu2 }
 0x1dd   :  { %v471_v19 = vadd.f32 %v1420_v62, %v470_v13  ;;  %v708_v13 = vadd.f32 %v693_v22, %v692_v7 }
 0x1df   :  { %v568_v60 = vsub.f32 %v471_v19, %v1024_v49  ;;  %v1059_v49 = vld [vmem:[%s1520_s7 + $0x38] sm:$0xff]  }
 0x1e0   :  { %v497_v14 = vpop.f32.mrf.mxu3  ;;  %v1045_v22 = vunpack.c.h.bf16 %v1059_v49 }
 0x1e1   :  { %v1447_v16 = vadd.f32 %v1420_v62, %v497_v14  ;;  %v600_v9 = vmul.f32 %v568_v60, %v568_v60  ;;  %v695_v14 = vmul.f32 %v630_v54, %v599_v63  ;;  %v577_v60 = vsub.f32 %v1431_v6, %v1041_v21 }
 0x1e3   :  { %v1012_v17 = vpack.c.bf16 %v1447_v16, %v1444_v15  ;;  %v579_v7 = vsub.f32 %v1447_v16, %v1045_v22 }
 0x1e4   :  { %v472_v18 = vpop.f32.mrf.mxu2 }
 0x1e5   :  { %v473_v20 = vadd.f32 %v1420_v62, %v472_v18  ;;  %1052 = vst [vmem:[%s1522_s9 + $0x38] sm:$0xff] %v1012_v17   ;;  %v650_v17 = vpop.permute.xlu1 %649  ;;  %v1057_v18 = vld [vmem:[%s1520_s7 + $0x28] sm:$0xff]  }
 0x1e6   :  { %v1036_v32 = vunpack.c.l.bf16 %v1057_v18  ;;  %v1037_v53 = vunpack.c.h.bf16 %v1057_v18 }
 0x1e7   :  { %v987_v23 = vpack.c.bf16 %v473_v20, %v471_v19  ;;  %v569_v1 = vsub.f32 %v473_v20, %v1025_v56  ;;  %v1044_v56 = vunpack.c.l.bf16 %v1059_v49 }
 0x1e9   :  { %1047 = vst [vmem:[%s1522_s9 + $0x10] sm:$0xff] %v987_v23   ;;  %v601_v19 = vmul.f32 %v569_v1, %v569_v1  ;;  %v1033_v23 = vunpack.c.h.bf16 %v1056_v0 }
 0x1eb   :  { %v697_v37 = vmul.f32 %v640_v55, %v601_v19  ;;  %v670_v55 = vpop.permute.xlu2 %669 }
 0x1ec   :  { %v475_v24 = vpop.f32.mrf.mxu2 }
 0x1ed   :  { %v476_v28 = vadd.f32 %v1420_v62, %v475_v24  ;;  %v709_v24 = vadd.f32 %v708_v13, %v694_v8  ;;  %v665_v47 = vpop.permute.xlu1 %664 }
 0x1ef   :  { %v570_v10 = vsub.f32 %v476_v28, %v1028_v61  ;;  %v710_v33 = vadd.f32 %v709_v24, %v695_v14 }
 0x1f3   :  { %v685_v13 = vpop.permute.xlu2 %684 }
 0x1f4   :  { %v477_v27 = vpop.f32.mrf.mxu2 }
 0x1f5   :  { %v478_v29 = vadd.f32 %v1420_v62, %v477_v27  ;;  %v696_v27 = vmul.f32 %v635_v31, %v600_v9  ;;  %v1040_v31 = vunpack.c.l.bf16 %v1058_v36  ;;  %v680_v9 = vpop.permute.xlu1 %679 }
 0x1f7   :  { %v992_v34 = vpack.c.bf16 %v478_v29, %v476_v28  ;;  %v571_v20 = vsub.f32 %v478_v29, %v1029_v2  ;;  %v602_v28 = vmul.f32 %v570_v10, %v570_v10  ;;  %v711_v40 = vadd.f32 %v710_v33, %v696_v27 }
 0x1f8   :  { %v576_v54 = vsub.f32 %v1428_v4, %v1040_v31  ;;  %v578_v2 = vsub.f32 %v1444_v15, %v1044_v56 }
 0x1f9   :  { %1048 = vst [vmem:[%s1522_s9 + $0x18] sm:$0xff] %v992_v34   ;;  %v660_v34 = vpop.permute.xlu0 %659  ;;  %v603_v29 = vmul.f32 %v571_v20, %v571_v20  ;;  %v698_v41 = vmul.f32 %v645_v59, %v602_v28  ;;  %v712_v44 = vadd.f32 %v711_v40, %v697_v37 }
 0x1fb   :  { %v713_v48 = vadd.f32 %v712_v44, %v698_v41  ;;  %v768_v27 = vpop.xlane.xlu2 %767 }
 0x1fc   :  { %v480_v45 = vpop.f32.mrf.mxu2  ;;  %v769_v16 = vrot.slane %v768_v27, 4 }
 0x1fd   :  { %v481_v3 = vadd.f32 %v1420_v62, %v480_v45  ;;  %v699_v45 = vmul.f32 %v650_v17, %v603_v29  ;;  %v611_v17 = vmul.f32 %v579_v7, %v579_v7 }
 0x1fe   :  { %v770_v28 = vadd.f32 %v769_v16, %v768_v27 }
 0x1ff   :  { %v572_v30 = vsub.f32 %v481_v3, %v1032_v11  ;;  %v714_v57 = vadd.f32 %v713_v48, %v699_v45  ;;  %v610_v11 = vmul.f32 %v578_v2, %v578_v2 }
 0x201   :  { %v604_v42 = vmul.f32 %v572_v30, %v572_v30  ;;  %v675_v61 = vpop.permute.xlu0 %674  ;;  %v706_v19 = vmul.f32 %v685_v13, %v610_v11  ;;  %v771_v30 = vrot.slane %v770_v28, 2 }
 0x203   :  { %v700_v50 = vmul.f32 %v655_v25, %v604_v42 }
 0x204   :  { %v482_v26 = vpop.f32.mrf.mxu2 }
 0x205   :  { %v483_v5 = vadd.f32 %v1420_v62, %v482_v26  ;;  %v715_v63 = vadd.f32 %v714_v57, %v700_v50 }
 0x207   :  { %v997_v12 = vpack.c.bf16 %v483_v5, %v481_v3  ;;  %v573_v38 = vsub.f32 %v483_v5, %v1033_v23  ;;  %v608_v3 = vmul.f32 %v576_v54, %v576_v54 }
 0x209   :  { %1049 = vst [vmem:[%s1522_s9 + $0x20] sm:$0xff] %v997_v12   ;;  %v605_v46 = vmul.f32 %v573_v38, %v573_v38  ;;  %v704_v10 = vmul.f32 %v675_v61, %v608_v3  ;;  %v690_v18 = vpop.permute.xlu0 %689 }
 0x20a   :  { %v707_v23 = vmul.f32 %v690_v18, %v611_v17 }
 0x20b   :  { %v701_v58 = vmul.f32 %v660_v34, %v605_v46 }
 0x20c   :  { %v485_v35 = vpop.f32.mrf.mxu2 }
 0x20d   :  { %v486_v39 = vadd.f32 %v1420_v62, %v485_v35  ;;  %v716_v5 = vadd.f32 %v715_v63, %v701_v58  ;;  %v772_v35 = vadd.f32 %v771_v30, %v770_v28 }
 0x20f   :  { %v574_v43 = vsub.f32 %v486_v39, %v1036_v32  ;;  %v773_v29 = vrot.slane %v772_v35, 1 }
 0x211   :  { %v606_v51 = vmul.f32 %v574_v43, %v574_v43  ;;  %v774_v40 = vadd.f32 %v773_v29, %v772_v35 }
 0x213   :  { %v702_v0 = vmul.f32 %v665_v47, %v606_v51 }
 0x214   :  { %v487_v52 = vpop.f32.mrf.mxu2 }
 0x215   :  { %v488_v59 = vadd.f32 %v1420_v62, %v487_v52  ;;  %v609_v62 = vmul.f32 %v577_v60, %v577_v60  ;;  %v717_v8 = vadd.f32 %v716_v5, %v702_v0 }
 0x217   :  { %v1002_v26 = vpack.c.bf16 %v488_v59, %v486_v39  ;;  %v575_v1 = vsub.f32 %v488_v59, %v1037_v53  ;;  %v705_v14 = vmul.f32 %v680_v9, %v609_v62 }
 0x219   :  { %1050 = vst [vmem:[%s1522_s9 + $0x28] sm:$0xff] %v1002_v26   ;;  %v607_v4 = vmul.f32 %v575_v1, %v575_v1  ;;  %s1150_s9 = smov [#allocation2]  }
 0x21a   :  { %s785_s28 = sshll.u32 %s1150_s9, 4  ;;  %s786_s28 = int_to_ptr.vmem [resolvable:$true] %s785_s28 }
 0x21b   :  { %v703_v6 = vmul.f32 %v670_v55, %v607_v4 }
 0x21d   :  { %v718_v12 = vadd.f32 %v717_v8, %v703_v6 }
 0x21f   :  { %v719_v15 = vadd.f32 %v718_v12, %v704_v10 }
 0x221   :  { %v720_v20 = vadd.f32 %v719_v15, %v705_v14 }
 0x223   :  { %v721_v24 = vadd.f32 %v720_v20, %v706_v19 }
 0x225   :  { %v722_v25 = vadd.f32 %v721_v24, %v707_v23 }
 0x227   :  { %723 = vadd.xlane.f32.xlu1 %v722_v25 }
 0x29a   :  { %v724_v32 = vpop.xlane.xlu1 %723 }
 0x29b   :  { %v725_v33 = vrot.slane %v724_v32, 4 }
 0x29d   :  { %v726_v34 = vadd.f32 %v725_v33, %v724_v32 }
 0x29f   :  { %v727_v36 = vrot.slane %v726_v34, 2 }
 0x2a1   :  { %v728_v37 = vadd.f32 %v727_v36, %v726_v34 }
 0x2a3   :  { %v729_v38 = vrot.slane %v728_v37, 1 }
 0x2a5   :  { %v730_v39 = vadd.f32 %v729_v38, %v728_v37 }
 0x2a7   :  { %1084 = vpush %v730_v39 }
 0x2a8   :  { %1086 = vpush %v774_v40 }
 0x2d8   :  { %s1085_s18 = spop %1084 }
 0x2d9   :  { %v732_v41 = vstv %s1085_s18  ;;  %s1087_s19 = spop %1086 }
 0x2da   :  { %734 = vst.msk [vmem:[#allocation2] sm:$0x1] %vm733_vm1, %v732_v41  ;;  %v776_v42 = vstv %s1087_s19 }
 0x2db   :  { %777 = vst.msk [vmem:[#allocation4] sm:$0x1] %vm733_vm1, %v776_v42  ;;  %790 = dma.vmem_to_hbm [thread:$0]  %s786_s28, 16, %s788_s12, [#allocation3]  }
 0x2dc   :  { %801 = dma.vmem_to_hbm [thread:$0]  %s797_s14, 16, %s799_s17, [#allocation5]  }
 0x2dd   :  { %1145 = dma.done.wait [#allocation3], 16  }
 0x2de   :  { %1146 = vsyncadd [#allocation3], 4294967280 }
 0x2df   :  { %1147 = dma.done.wait [#allocation5], 16  }
 0x2e0   :  { %1148 = vsyncadd [#allocation5], 4294967280 }
 0x2e1   :  { %812 = vsyncpa [#allocation3], 1 }
 0x2e2   :  { %813 = vsyncpa [#allocation5], 1 }

// kernel: _mlp_forward_core.1
= control target key start
LH: loop header
LB: loop body
LE: loop exit
PB: predicated region body
PF: predicated region fallthrough
CT: control target
= control target key end

     0   :  { %17 = vsyncpa [#allocation3], 0  ;;  %s1513_s0 = inlined_call_operand.vmem [shape: bf16[128,128], index: 0, kind: input, shape index: {}]   ;;  %s1514_s1 = inlined_call_operand.vmem [shape: bf16[128,128], index: 1, kind: input, shape index: {}]   ;;  %s1515_s2 = inlined_call_operand.vmem [shape: f32[1,128], index: 2, kind: input, shape index: {}]   ;;  %s1516_s3 = inlined_call_operand.vmem [shape: bf16[128,128], index: 3, kind: input, shape index: {}]   ;;  %s1517_s4 = inlined_call_operand.vmem [shape: f32[1,128], index: 4, kind: input, shape index: {}]   ;;  %s1518_s5 = inlined_call_operand.vmem [shape: bf16[128,128], index: 5, kind: input, shape index: {}]   ;;  %s1519_s6 = inlined_call_operand.vmem [shape: f32[1,128], index: 6, kind: input, shape index: {}]   ;;  %s1520_s7 = inlined_call_operand.vmem [shape: bf16[128,128], index: 7, kind: input, shape index: {}]   ;;  %s1521_s8 = inlined_call_operand.vmem [shape: f32[128,1], index: 8, kind: input, shape index: {}]   ;;  %s1522_s9 = inlined_call_operand.vmem [shape: bf16[128,128], index: 9, kind: output, shape index: {0}]   ;;  %s1523_s10 = inlined_call_operand.hbm [shape: f32[1,1], index: 10, kind: output, shape index: {1}]   ;;  %s1524_s11 = inlined_call_operand.hbm [shape: f32[1,1], index: 11, kind: output, shape index: {2}]  }
   0x1   :  { %v957_v0 = vld [vmem:[%s1514_s1 + $0x38] sm:$0xff]  ;;  %v956_v1 = vld [vmem:[%s1514_s1 + $0x30] sm:$0xff] }
   0x2   :  { %169 = vmatpush.bf16.msra.mxu0 %v957_v0  ;;  %1060 = vmatpush.bf16.msra.mxu3 %v957_v0 }
   0x3   :  { %18 = vsyncpa [#allocation5], 0  ;;  %v955_v2 = vld [vmem:[%s1514_s1 + $0x28] sm:$0xff]  ;;  %v954_v3 = vld [vmem:[%s1514_s1 + $0x20] sm:$0xff]  ;;  %vm735_vm0 = vcmask 7168   ;;  %s787_s12 = sshll.u32 %s1523_s10, 4  ;;  %s788_s12 = int_to_ptr.hbm [resolvable:$true] %s787_s12 }
   0x4   :  { %v953_v4 = vld [vmem:[%s1514_s1 + $0x18] sm:$0xff]  ;;  %v952_v5 = vld [vmem:[%s1514_s1 + $0x10] sm:$0xff]  ;;  %v951_v6 = vld [vmem:[%s1514_s1 + $0x8] sm:$0xff]  ;;  %s1151_s13 = smov [#allocation4]   ;;  %s798_s17 = sshll.u32 %s1524_s11, 4  ;;  %vm733_vm1 = vcmask 0   ;;  %s799_s17 = int_to_ptr.hbm [resolvable:$true] %s798_s17 }
   0x5   :  { %v950_v7 = vld [vmem:[%s1514_s1] sm:$0xff]  ;;  %v948_v9 = vld [vmem:[%s1513_s0 + $0x30] sm:$0xff]  ;;  %v943_v10 = vld [vmem:[%s1513_s0 + $0x8] sm:$0xff]  ;;  %s796_s14 = sshll.u32 %s1151_s13, 4  ;;  %s797_s14 = int_to_ptr.vmem [resolvable:$true] %s796_s14 }
   0x6   :  { %170 = vmatpush.bf16.msra.mxu0 %v956_v1  ;;  %1061 = vmatpush.bf16.msra.mxu3 %v956_v1  ;;  %v942_v8 = vld [vmem:[%s1513_s0] sm:$0xff]  ;;  %v949_v11 = vld [vmem:[%s1513_s0 + $0x38] sm:$0xff]  ;;  %v944_v12 = vld [vmem:[%s1513_s0 + $0x10] sm:$0xff] }
   0x7   :  { %v945_v13 = vld [vmem:[%s1513_s0 + $0x18] sm:$0xff]  ;;  %v964_v15 = vld [vmem:[%s1516_s3 + $0x30] sm:$0xff]  ;;  %v963_v16 = vld [vmem:[%s1516_s3 + $0x28] sm:$0xff] }
   0x8   :  { %v965_v14 = vld [vmem:[%s1516_s3 + $0x38] sm:$0xff]  ;;  %v962_v17 = vld [vmem:[%s1516_s3 + $0x20] sm:$0xff]  ;;  %v947_v19 = vld [vmem:[%s1513_s0 + $0x28] sm:$0xff] }
   0x9   :  { %310 = vmatpush.bf16.msra.mxu1 %v965_v14  ;;  %v946_v18 = vld [vmem:[%s1513_s0 + $0x20] sm:$0xff]  ;;  %v961_v20 = vld [vmem:[%s1516_s3 + $0x18] sm:$0xff]  ;;  %v960_v21 = vld [vmem:[%s1516_s3 + $0x10] sm:$0xff] }
   0xa   :  { %171 = vmatpush.bf16.msra.mxu0 %v955_v2  ;;  %1062 = vmatpush.bf16.msra.mxu3 %v955_v2  ;;  %v959_v22 = vld [vmem:[%s1516_s3 + $0x8] sm:$0xff]  ;;  %v958_v23 = vld [vmem:[%s1516_s3] sm:$0xff] }
   0xb   :  { %v1287_v25 = vld [vmem:[%s1515_s2] ss:$0 sm:$0xff] }
   0xd   :  { %311 = vmatpush.bf16.msra.mxu1 %v964_v15 }
   0xe   :  { %172 = vmatpush.bf16.msra.mxu0 %v954_v3  ;;  %1063 = vmatpush.bf16.msra.mxu3 %v954_v3  ;;  %v973_v3 = vld [vmem:[%s1518_s5 + $0x38] sm:$0xff] }
   0xf   :  { %451 = vmatpush.bf16.msra.mxu2 %v973_v3 }
  0x11   :  { %312 = vmatpush.bf16.msra.mxu1 %v963_v16 }
  0x12   :  { %173 = vmatpush.bf16.msra.mxu0 %v953_v4  ;;  %1064 = vmatpush.bf16.msra.mxu3 %v953_v4 }
  0x15   :  { %313 = vmatpush.bf16.msra.mxu1 %v962_v17 }
  0x16   :  { %174 = vmatpush.bf16.msra.mxu0 %v952_v5  ;;  %1065 = vmatpush.bf16.msra.mxu3 %v952_v5  ;;  %v972_v5 = vld [vmem:[%s1518_s5 + $0x30] sm:$0xff] }
  0x17   :  { %452 = vmatpush.bf16.msra.mxu2 %v972_v5 }
  0x19   :  { %314 = vmatpush.bf16.msra.mxu1 %v961_v20 }
  0x1a   :  { %175 = vmatpush.bf16.msra.mxu0 %v951_v6  ;;  %1066 = vmatpush.bf16.msra.mxu3 %v951_v6  ;;  %v971_v6 = vld [vmem:[%s1518_s5 + $0x28] sm:$0xff] }
  0x1b   :  { %453 = vmatpush.bf16.msra.mxu2 %v971_v6 }
  0x1d   :  { %315 = vmatpush.bf16.msra.mxu1 %v960_v21 }
  0x1e   :  { %176 = vmatpush.bf16.msra.mxu0 %v950_v7  ;;  %1067 = vmatpush.bf16.msra.mxu3 %v950_v7 }
  0x21   :  { %177 = vmatmul.bf16.vlgmr.msra.gmra.mxu0 %v942_v8  ;;  %207 = vmatmul.bf16.vlgmr.msra.gmra.mxu3 %v948_v9 }
  0x22   :  { %1068 = vmatpush.bf16.msrb.mxu3 %v965_v14  ;;  %316 = vmatpush.bf16.msra.mxu1 %v959_v22 }
  0x26   :  { %1069 = vmatpush.bf16.msrb.mxu3 %v964_v15  ;;  %317 = vmatpush.bf16.msra.mxu1 %v958_v23 }
  0x2a   :  { %1070 = vmatpush.bf16.msrb.mxu3 %v963_v16 }
  0x2e   :  { %1071 = vmatpush.bf16.msrb.mxu3 %v962_v17 }
  0x31   :  { %182 = vmatmul.bf16.gmra.mxu0 %v943_v10  ;;  %212 = vmatmul.bf16.gmra.mxu3 %v949_v11  ;;  %v970_v10 = vld [vmem:[%s1518_s5 + $0x20] sm:$0xff] }
  0x32   :  { %1072 = vmatpush.bf16.msrb.mxu3 %v961_v20  ;;  %454 = vmatpush.bf16.msra.mxu2 %v970_v10 }
  0x36   :  { %1073 = vmatpush.bf16.msrb.mxu3 %v960_v21  ;;  %v969_v21 = vld [vmem:[%s1518_s5 + $0x18] sm:$0xff] }
  0x37   :  { %455 = vmatpush.bf16.msra.mxu2 %v969_v21 }
  0x3a   :  { %1074 = vmatpush.bf16.msrb.mxu3 %v959_v22  ;;  %v968_v22 = vld [vmem:[%s1518_s5 + $0x10] sm:$0xff] }
  0x3b   :  { %456 = vmatpush.bf16.msra.mxu2 %v968_v22 }
  0x3e   :  { %1075 = vmatpush.bf16.msrb.mxu3 %v958_v23  ;;  %v967_v23 = vld [vmem:[%s1518_s5 + $0x8] sm:$0xff] }
  0x3f   :  { %457 = vmatpush.bf16.msra.mxu2 %v967_v23 }
  0x41   :  { %187 = vmatmul.bf16.gmra.mxu0 %v944_v12 }
  0x42   :  { %1076 = vmatpush.bf16.msra.mxu3 %v973_v3 }
  0x46   :  { %1077 = vmatpush.bf16.msra.mxu3 %v972_v5 }
  0x4a   :  { %1078 = vmatpush.bf16.msra.mxu3 %v971_v6 }
  0x4e   :  { %1079 = vmatpush.bf16.msra.mxu3 %v970_v10  ;;  %v589_v10 = vld [vmem:[%s1521_s8 + $0x48] sm:$0xff] }
  0x51   :  { %192 = vmatmul.bf16.gmra.mxu0 %v945_v13 }
  0x52   :  { %1080 = vmatpush.bf16.msra.mxu3 %v969_v21  ;;  %v1383_v21 = vld [vmem:[%s1521_s8 + $0x68] sm:$0xff] }
  0x56   :  { %1081 = vmatpush.bf16.msra.mxu3 %v968_v22  ;;  %v1388_v22 = vld [vmem:[%s1521_s8 + $0x78] sm:$0xff] }
  0x5a   :  { %1082 = vmatpush.bf16.msra.mxu3 %v967_v23 }
  0x61   :  { %197 = vmatmul.bf16.gmra.mxu0 %v946_v18 }
  0x71   :  { %202 = vmatmul.bf16.gmra.mxu0 %v947_v19 }
  0x9e   :  { %v178_v24 = vpop.f32.mrf.mxu0 }
  0x9f   :  { %v179_v27 = vadd.f32 %v1287_v25, %v178_v24  ;;  %v966_v24 = vld [vmem:[%s1518_s5] sm:$0xff] }
  0xa0   :  { %458 = vmatpush.bf16.msra.mxu2 %v966_v24  ;;  %1083 = vmatpush.bf16.msra.mxu3 %v966_v24 }
  0xa1   :  { %v218_v30 = vmax.f32 %v179_v27, 0.0  ;;  %v580_v27 = vld [vmem:[%s1521_s8] sm:$0xff] }
  0xa4   :  { %v208_v26 = vpop.f32.mrf.mxu3 }
  0xa5   :  { %v209_v32 = vadd.f32 %v1287_v25, %v208_v26  ;;  %v1332_v26 = vld [vmem:[%s1517_s4] ss:$0 sm:$0xff] }
  0xa6   :  { %v180_v28 = vpop.f32.mrf.mxu0 }
  0xa7   :  { %v181_v29 = vadd.f32 %v1287_v25, %v180_v28  ;;  %v230_v35 = vmax.f32 %v209_v32, 0.0  ;;  %v1149_v28 = vmov 0   ;;  %v736_v32 = vsel %vm735_vm0, %v580_v27, 0.0 }
  0xa8   :  { %1091 = vset.pattern.permute.xlu0 %v1149_v28  ;;  %1092 = vset.pattern.permute.xlu1 %v1149_v28 }
  0xa9   :  { %v219_v31 = vmax.f32 %v181_v29, 0.0  ;;  %614 = vperm.xlu0 %1091, %v580_v27   ;;  %1093 = vset.pattern.permute.xlu2 %v1149_v28  ;;  %v585_v27 = vld [vmem:[%s1521_s8 + $0x28] sm:$0xff] }
  0xab   :  { %v234_v33 = vpack.c.bf16 %v219_v31, %v218_v30 }
  0xac   :  { %v210_v34 = vpop.f32.mrf.mxu3 }
  0xad   :  { %318 = vmatmul.bf16.vlgmr.msra.gmra.mxu1 %v234_v33  ;;  %v211_v36 = vadd.f32 %v1287_v25, %v210_v34 }
  0xae   :  { %v183_v37 = vpop.f32.mrf.mxu0 }
  0xaf   :  { %v231_v38 = vmax.f32 %v211_v36, 0.0  ;;  %v184_v41 = vadd.f32 %v1287_v25, %v183_v37 }
  0xb1   :  { %v240_v39 = vpack.c.bf16 %v231_v38, %v230_v35  ;;  %v220_v44 = vmax.f32 %v184_v41, 0.0  ;;  %v581_v35 = vld [vmem:[%s1521_s8 + $0x8] sm:$0xff] }
  0xb2   :  { %v737_v37 = vsel %vm735_vm0, %v581_v35, 0.0  ;;  %619 = vperm.xlu0 %1091, %v581_v35  }
  0xb3   :  { %348 = vmatmul.bf16.vlgmr.msrb.gmra.mxu3 %v240_v39  ;;  %v738_v39 = vadd.f32 %v737_v37, %v736_v32  ;;  %v753_v37 = vsel %vm735_vm0, %v589_v10, 0.0 }
  0xb4   :  { %v213_v40 = vpop.f32.mrf.mxu3 }
  0xb5   :  { %v214_v46 = vadd.f32 %v1287_v25, %v213_v40 }
  0xb6   :  { %v185_v42 = vpop.f32.mrf.mxu0 }
  0xb7   :  { %v186_v43 = vadd.f32 %v1287_v25, %v185_v42  ;;  %v232_v49 = vmax.f32 %v214_v46, 0.0  ;;  %v582_v42 = vld [vmem:[%s1521_s8 + $0x10] sm:$0xff] }
  0xb8   :  { %624 = vperm.xlu1 %1092, %v582_v42  }
  0xb9   :  { %v221_v45 = vmax.f32 %v186_v43, 0.0 }
  0xbb   :  { %v235_v47 = vpack.c.bf16 %v221_v45, %v220_v44  ;;  %v739_v44 = vsel %vm735_vm0, %v582_v42, 0.0 }
  0xbc   :  { %v215_v48 = vpop.f32.mrf.mxu3 }
  0xbd   :  { %323 = vmatmul.bf16.gmra.mxu1 %v235_v47  ;;  %v216_v50 = vadd.f32 %v1287_v25, %v215_v48  ;;  %v740_v47 = vadd.f32 %v739_v44, %v738_v39  ;;  %v591_v44 = vld [vmem:[%s1521_s8 + $0x58] sm:$0xff] }
  0xbe   :  { %v188_v51 = vpop.f32.mrf.mxu0 }
  0xbf   :  { %v233_v52 = vmax.f32 %v216_v50, 0.0  ;;  %v189_v54 = vadd.f32 %v1287_v25, %v188_v51 }
  0xc1   :  { %v241_v53 = vpack.c.bf16 %v233_v52, %v232_v49  ;;  %v222_v57 = vmax.f32 %v189_v54, 0.0 }
  0xc3   :  { %353 = vmatmul.bf16.gmra.mxu3 %v241_v53 }
  0xc6   :  { %v190_v55 = vpop.f32.mrf.mxu0 }
  0xc7   :  { %v191_v56 = vadd.f32 %v1287_v25, %v190_v55  ;;  %v583_v55 = vld [vmem:[%s1521_s8 + $0x18] sm:$0xff] }
  0xc8   :  { %629 = vperm.xlu1 %1092, %v583_v55  }
  0xc9   :  { %v223_v58 = vmax.f32 %v191_v56, 0.0 }
  0xcb   :  { %v236_v59 = vpack.c.bf16 %v223_v58, %v222_v57  ;;  %v741_v57 = vsel %vm735_vm0, %v583_v55, 0.0 }
  0xcd   :  { %328 = vmatmul.bf16.gmra.mxu1 %v236_v59  ;;  %v742_v59 = vadd.f32 %v741_v57, %v740_v47  ;;  %v594_v57 = vld [vmem:[%s1521_s8 + $0x70] sm:$0xff] }
  0xce   :  { %v193_v60 = vpop.f32.mrf.mxu0 }
  0xcf   :  { %v194_v61 = vadd.f32 %v1287_v25, %v193_v60 }
  0xd1   :  { %v224_v0 = vmax.f32 %v194_v61, 0.0 }
  0xd6   :  { %v195_v62 = vpop.f32.mrf.mxu0 }
  0xd7   :  { %v196_v63 = vadd.f32 %v1287_v25, %v195_v62  ;;  %v586_v62 = vld [vmem:[%s1521_s8 + $0x30] sm:$0xff] }
  0xd8   :  { %644 = vperm.xlu0 %1091, %v586_v62  }
  0xd9   :  { %v225_v1 = vmax.f32 %v196_v63, 0.0 }
  0xdb   :  { %v237_v2 = vpack.c.bf16 %v225_v1, %v224_v0 }
  0xdd   :  { %333 = vmatmul.bf16.gmra.mxu1 %v237_v2 }
  0xde   :  { %v198_v4 = vpop.f32.mrf.mxu0 }
  0xdf   :  { %v199_v7 = vadd.f32 %v1287_v25, %v198_v4 }
  0xe0   :  { %659 = vperm.xlu0 %1091, %v589_v10  }
  0xe1   :  { %v226_v11 = vmax.f32 %v199_v7, 0.0 }
  0xe6   :  { %v200_v8 = vpop.f32.mrf.mxu0 }
  0xe7   :  { %v201_v9 = vadd.f32 %v1287_v25, %v200_v8 }
  0xe9   :  { %v227_v12 = vmax.f32 %v201_v9, 0.0  ;;  %v587_v9 = vld [vmem:[%s1521_s8 + $0x38] sm:$0xff] }
  0xea   :  { %649 = vperm.xlu1 %1092, %v587_v9   ;;  %v749_v32 = vsel %vm735_vm0, %v587_v9, 0.0 }
  0xeb   :  { %v238_v13 = vpack.c.bf16 %v227_v12, %v226_v11 }
  0xed   :  { %338 = vmatmul.bf16.gmra.mxu1 %v238_v13  ;;  %v590_v13 = vld [vmem:[%s1521_s8 + $0x50] sm:$0xff] }
  0xee   :  { %v203_v14 = vpop.f32.mrf.mxu0 }
  0xef   :  { %v204_v15 = vadd.f32 %v1287_v25, %v203_v14  ;;  %v592_v14 = vld [vmem:[%s1521_s8 + $0x60] sm:$0xff] }
  0xf0   :  { %674 = vperm.xlu0 %1091, %v592_v14  }
  0xf1   :  { %v228_v18 = vmax.f32 %v204_v15, 0.0 }
  0xf2   :  { %664 = vperm.xlu1 %1092, %v590_v13  }
  0xf6   :  { %v205_v16 = vpop.f32.mrf.mxu0 }
  0xf7   :  { %v206_v17 = vadd.f32 %v1287_v25, %v205_v16 }
  0xf8   :  { %689 = vperm.xlu0 %1091, %v1388_v22  }
  0xf9   :  { %v229_v19 = vmax.f32 %v206_v17, 0.0 }
  0xfa   :  { %679 = vperm.xlu1 %1092, %v1383_v21  }
  0xfb   :  { %v239_v20 = vpack.c.bf16 %v229_v19, %v228_v18 }
  0xfd   :  { %343 = vmatmul.bf16.gmra.mxu1 %v239_v20  ;;  %v584_v20 = vld [vmem:[%s1521_s8 + $0x20] sm:$0xff] }
  0xfe   :  { %634 = vperm.xlu2 %1093, %v584_v20   ;;  %v743_v23 = vsel %vm735_vm0, %v584_v20, 0.0 }
 0x106   :  { %639 = vperm.xlu2 %1093, %v585_v27  }
 0x12a   :  { %v319_v25 = vpop.f32.mrf.mxu1 }
 0x12b   :  { %v320_v29 = vadd.f32 %v1332_v26, %v319_v25  ;;  %v744_v25 = vadd.f32 %v743_v23, %v742_v59 }
 0x12d   :  { %v359_v33 = vmax.f32 %v320_v29, 0.0  ;;  %v747_v29 = vsel %vm735_vm0, %v586_v62, 0.0  ;;  %v1420_v62 = vld [vmem:[%s1519_s6] ss:$0 sm:$0xff] }
 0x132   :  { %v321_v30 = vpop.f32.mrf.mxu1 }
 0x133   :  { %v322_v31 = vadd.f32 %v1332_v26, %v321_v30  ;;  %v745_v30 = vsel %vm735_vm0, %v585_v27, 0.0 }
 0x135   :  { %v360_v34 = vmax.f32 %v322_v31, 0.0  ;;  %v746_v31 = vadd.f32 %v745_v30, %v744_v25  ;;  %v615_v25 = vpop.permute.xlu0 %614  ;;  %v625_v30 = vpop.permute.xlu1 %624 }
 0x136   :  { %v349_v36 = vpop.f32.mrf.mxu3 }
 0x137   :  { %v375_v38 = vpack.c.bf16 %v360_v34, %v359_v33  ;;  %v350_v41 = vadd.f32 %v1332_v26, %v349_v36  ;;  %v748_v33 = vadd.f32 %v747_v29, %v746_v31  ;;  %v588_v34 = vld [vmem:[%s1521_s8 + $0x40] sm:$0xff] }
 0x138   :  { %v751_v35 = vsel %vm735_vm0, %v588_v34, 0.0  ;;  %654 = vperm.xlu2 %1093, %v588_v34  }
 0x139   :  { %459 = vmatmul.bf16.vlgmr.msra.gmra.mxu2 %v375_v38  ;;  %v371_v45 = vmax.f32 %v350_v41, 0.0  ;;  %v750_v36 = vadd.f32 %v749_v32, %v748_v33  ;;  %v755_v41 = vsel %vm735_vm0, %v590_v13, 0.0  ;;  %v1015_v32 = vld [vmem:[%s1520_s7] sm:$0xff]   ;;  %v1053_v33 = vld [vmem:[%s1520_s7 + $0x8] sm:$0xff]  }
 0x13a   :  { %v324_v40 = vpop.f32.mrf.mxu1 }
 0x13b   :  { %v325_v48 = vadd.f32 %v1332_v26, %v324_v40  ;;  %v752_v39 = vadd.f32 %v751_v35, %v750_v36  ;;  %v761_v35 = vsel %vm735_vm0, %v1383_v21, 0.0  ;;  %v1017_v36 = vunpack.c.h.bf16 %v1015_v32 }
 0x13c   :  { %v765_v21 = vsel %vm735_vm0, %v1388_v22, 0.0 }
 0x13d   :  { %v361_v53 = vmax.f32 %v325_v48, 0.0 }
 0x13e   :  { %v351_v43 = vpop.f32.mrf.mxu3 }
 0x13f   :  { %v352_v46 = vadd.f32 %v1332_v26, %v351_v43  ;;  %v754_v43 = vadd.f32 %v753_v37, %v752_v39  ;;  %v763_v37 = vsel %vm735_vm0, %v594_v57, 0.0  ;;  %v620_v39 = vpop.permute.xlu0 %619 }
 0x140   :  { %669 = vperm.xlu2 %1093, %v591_v44  }
 0x141   :  { %v372_v49 = vmax.f32 %v352_v46, 0.0  ;;  %v756_v48 = vadd.f32 %v755_v41, %v754_v43  ;;  %v1021_v43 = vunpack.c.h.bf16 %v1053_v33 }
 0x142   :  { %v326_v50 = vpop.f32.mrf.mxu1 }
 0x143   :  { %v327_v51 = vadd.f32 %v1332_v26, %v326_v50  ;;  %v381_v52 = vpack.c.bf16 %v372_v49, %v371_v45  ;;  %v757_v45 = vsel %vm735_vm0, %v591_v44, 0.0  ;;  %v759_v49 = vsel %vm735_vm0, %v592_v14, 0.0  ;;  %v1054_v44 = vld [vmem:[%s1520_s7 + $0x10] sm:$0xff]  }
 0x145   :  { %v362_v54 = vmax.f32 %v327_v51, 0.0  ;;  %489 = vmatmul.bf16.vlgmr.msra.gmra.mxu3 %v381_v52  ;;  %v758_v51 = vadd.f32 %v757_v45, %v756_v48 }
 0x146   :  { %v354_v56 = vpop.f32.mrf.mxu3 }
 0x147   :  { %v376_v58 = vpack.c.bf16 %v362_v54, %v361_v53  ;;  %v355_v61 = vadd.f32 %v1332_v26, %v354_v56  ;;  %v760_v52 = vadd.f32 %v759_v49, %v758_v51  ;;  %v1024_v49 = vunpack.c.l.bf16 %v1054_v44 }
 0x148   :  { %684 = vperm.xlu2 %1093, %v594_v57  }
 0x149   :  { %464 = vmatmul.bf16.gmra.mxu2 %v376_v58  ;;  %v373_v0 = vmax.f32 %v355_v61, 0.0  ;;  %v762_v41 = vadd.f32 %v761_v35, %v760_v52  ;;  %v1055_v52 = vld [vmem:[%s1520_s7 + $0x18] sm:$0xff]  }
 0x14a   :  { %v329_v60 = vpop.f32.mrf.mxu1 }
 0x14b   :  { %v330_v2 = vadd.f32 %v1332_v26, %v329_v60 }
 0x14d   :  { %v363_v7 = vmax.f32 %v330_v2, 0.0 }
 0x14e   :  { %v356_v63 = vpop.f32.mrf.mxu3 }
 0x14f   :  { %v357_v1 = vadd.f32 %v1332_v26, %v356_v63 }
 0x151   :  { %v374_v3 = vmax.f32 %v357_v1, 0.0 }
 0x152   :  { %v331_v4 = vpop.f32.mrf.mxu1 }
 0x153   :  { %v332_v5 = vadd.f32 %v1332_v26, %v331_v4  ;;  %v382_v6 = vpack.c.bf16 %v374_v3, %v373_v0 }
 0x155   :  { %v364_v8 = vmax.f32 %v332_v5, 0.0  ;;  %494 = vmatmul.bf16.gmra.mxu3 %v382_v6 }
 0x157   :  { %v377_v11 = vpack.c.bf16 %v364_v8, %v363_v7 }
 0x158   :  { %v635_v31 = vpop.permute.xlu2 %634 }
 0x159   :  { %469 = vmatmul.bf16.gmra.mxu2 %v377_v11 }
 0x15a   :  { %v334_v12 = vpop.f32.mrf.mxu1 }
 0x15b   :  { %v335_v15 = vadd.f32 %v1332_v26, %v334_v12 }
 0x15d   :  { %v365_v18 = vmax.f32 %v335_v15, 0.0 }
 0x162   :  { %v336_v16 = vpop.f32.mrf.mxu1 }
 0x163   :  { %v337_v17 = vadd.f32 %v1332_v26, %v336_v16 }
 0x165   :  { %v366_v19 = vmax.f32 %v337_v17, 0.0 }
 0x167   :  { %v378_v24 = vpack.c.bf16 %v366_v19, %v365_v18 }
 0x169   :  { %474 = vmatmul.bf16.gmra.mxu2 %v378_v24 }
 0x16a   :  { %v339_v28 = vpop.f32.mrf.mxu1 }
 0x16b   :  { %v340_v38 = vadd.f32 %v1332_v26, %v339_v28 }
 0x16d   :  { %v367_v46 = vmax.f32 %v340_v38, 0.0  ;;  %v1016_v38 = vunpack.c.l.bf16 %v1015_v32 }
 0x172   :  { %v341_v40 = vpop.f32.mrf.mxu1 }
 0x173   :  { %v342_v42 = vadd.f32 %v1332_v26, %v341_v40  ;;  %v1020_v40 = vunpack.c.l.bf16 %v1053_v33 }
 0x175   :  { %v368_v47 = vmax.f32 %v342_v42, 0.0 }
 0x177   :  { %v379_v50 = vpack.c.bf16 %v368_v47, %v367_v46  ;;  %v764_v46 = vadd.f32 %v763_v37, %v762_v41 }
 0x179   :  { %479 = vmatmul.bf16.gmra.mxu2 %v379_v50  ;;  %v766_v50 = vadd.f32 %v765_v21, %v764_v46 }
 0x17a   :  { %v344_v53 = vpop.f32.mrf.mxu1 }
 0x17b   :  { %v345_v54 = vadd.f32 %v1332_v26, %v344_v53  ;;  %767 = vadd.xlane.f32.xlu2 %v766_v50 }
 0x17d   :  { %v369_v58 = vmax.f32 %v345_v54, 0.0  ;;  %v630_v54 = vpop.permute.xlu1 %629 }
 0x182   :  { %v346_v55 = vpop.f32.mrf.mxu1 }
 0x183   :  { %v347_v56 = vadd.f32 %v1332_v26, %v346_v55  ;;  %v640_v55 = vpop.permute.xlu2 %639 }
 0x185   :  { %v370_v59 = vmax.f32 %v347_v56, 0.0  ;;  %v1025_v56 = vunpack.c.h.bf16 %v1054_v44 }
 0x187   :  { %v380_v60 = vpack.c.bf16 %v370_v59, %v369_v58  ;;  %v645_v59 = vpop.permute.xlu0 %644 }
 0x189   :  { %484 = vmatmul.bf16.gmra.mxu2 %v380_v60 }
 0x1bc   :  { %v460_v61 = vpop.f32.mrf.mxu2 }
 0x1bd   :  { %v461_v0 = vadd.f32 %v1420_v62, %v460_v61  ;;  %v1028_v61 = vunpack.c.l.bf16 %v1055_v52 }
 0x1bf   :  { %v564_v47 = vsub.f32 %v461_v0, %v1016_v38 }
 0x1c1   :  { %v596_v57 = vmul.f32 %v564_v47, %v564_v47 }
 0x1c4   :  { %v462_v63 = vpop.f32.mrf.mxu2 }
 0x1c5   :  { %v463_v26 = vadd.f32 %v1420_v62, %v462_v63 }
 0x1c7   :  { %v977_v1 = vpack.c.bf16 %v463_v26, %v461_v0  ;;  %v565_v42 = vsub.f32 %v463_v26, %v1017_v36  ;;  %v1056_v0 = vld [vmem:[%s1520_s7 + $0x20] sm:$0xff]   ;;  %v1058_v36 = vld [vmem:[%s1520_s7 + $0x30] sm:$0xff]  }
 0x1c8   :  { %v490_v2 = vpop.f32.mrf.mxu3  ;;  %v1041_v21 = vunpack.c.h.bf16 %v1058_v36 }
 0x1c9   :  { %978 = vst [vmem:[%s1522_s9] sm:$0xff] %v977_v1   ;;  %v1428_v4 = vadd.f32 %v1420_v62, %v490_v2  ;;  %v597_v51 = vmul.f32 %v565_v42, %v565_v42  ;;  %v1029_v2 = vunpack.c.h.bf16 %v1055_v52 }
 0x1cb   :  { %v693_v22 = vmul.f32 %v620_v39, %v597_v51 }
 0x1cc   :  { %v465_v3 = vpop.f32.mrf.mxu2 }
 0x1cd   :  { %v466_v9 = vadd.f32 %v1420_v62, %v465_v3 }
 0x1cf   :  { %v566_v48 = vsub.f32 %v466_v9, %v1020_v40 }
 0x1d0   :  { %v492_v5 = vpop.f32.mrf.mxu3 }
 0x1d1   :  { %v1431_v6 = vadd.f32 %v1420_v62, %v492_v5  ;;  %v598_v58 = vmul.f32 %v566_v48, %v566_v48 }
 0x1d3   :  { %v1007_v7 = vpack.c.bf16 %v1431_v6, %v1428_v4 }
 0x1d4   :  { %v467_v8 = vpop.f32.mrf.mxu2 }
 0x1d5   :  { %v468_v10 = vadd.f32 %v1420_v62, %v467_v8  ;;  %1051 = vst [vmem:[%s1522_s9 + $0x30] sm:$0xff] %v1007_v7   ;;  %v692_v7 = vmul.f32 %v615_v25, %v596_v57  ;;  %v694_v8 = vmul.f32 %v625_v30, %v598_v58  ;;  %v655_v25 = vpop.permute.xlu2 %654 }
 0x1d7   :  { %v982_v11 = vpack.c.bf16 %v468_v10, %v466_v9  ;;  %v567_v53 = vsub.f32 %v468_v10, %v1021_v43 }
 0x1d8   :  { %v495_v12 = vpop.f32.mrf.mxu3 }
 0x1d9   :  { %1046 = vst [vmem:[%s1522_s9 + $0x8] sm:$0xff] %v982_v11   ;;  %v1444_v15 = vadd.f32 %v1420_v62, %v495_v12  ;;  %v599_v63 = vmul.f32 %v567_v53, %v567_v53  ;;  %v1032_v11 = vunpack.c.l.bf16 %v1056_v0 }
 0x1dc   :  { %v470_v13 = vpop.f32.mrf.mxu2 }
 0x1dd   :  { %v471_v19 = vadd.f32 %v1420_v62, %v470_v13  ;;  %v708_v13 = vadd.f32 %v693_v22, %v692_v7 }
 0x1df   :  { %v568_v60 = vsub.f32 %v471_v19, %v1024_v49  ;;  %v1059_v49 = vld [vmem:[%s1520_s7 + $0x38] sm:$0xff]  }
 0x1e0   :  { %v497_v14 = vpop.f32.mrf.mxu3  ;;  %v1045_v22 = vunpack.c.h.bf16 %v1059_v49 }
 0x1e1   :  { %v1447_v16 = vadd.f32 %v1420_v62, %v497_v14  ;;  %v600_v9 = vmul.f32 %v568_v60, %v568_v60  ;;  %v695_v14 = vmul.f32 %v630_v54, %v599_v63  ;;  %v577_v60 = vsub.f32 %v1431_v6, %v1041_v21 }
 0x1e3   :  { %v1012_v17 = vpack.c.bf16 %v1447_v16, %v1444_v15  ;;  %v579_v7 = vsub.f32 %v1447_v16, %v1045_v22 }
 0x1e4   :  { %v472_v18 = vpop.f32.mrf.mxu2 }
 0x1e5   :  { %v473_v20 = vadd.f32 %v1420_v62, %v472_v18  ;;  %1052 = vst [vmem:[%s1522_s9 + $0x38] sm:$0xff] %v1012_v17   ;;  %v650_v17 = vpop.permute.xlu1 %649  ;;  %v1057_v18 = vld [vmem:[%s1520_s7 + $0x28] sm:$0xff]  }
 0x1e6   :  { %v1036_v32 = vunpack.c.l.bf16 %v1057_v18  ;;  %v1037_v53 = vunpack.c.h.bf16 %v1057_v18 }
 0x1e7   :  { %v987_v23 = vpack.c.bf16 %v473_v20, %v471_v19  ;;  %v569_v1 = vsub.f32 %v473_v20, %v1025_v56  ;;  %v1044_v56 = vunpack.c.l.bf16 %v1059_v49 }
 0x1e9   :  { %1047 = vst [vmem:[%s1522_s9 + $0x10] sm:$0xff] %v987_v23   ;;  %v601_v19 = vmul.f32 %v569_v1, %v569_v1  ;;  %v1033_v23 = vunpack.c.h.bf16 %v1056_v0 }
 0x1eb   :  { %v697_v37 = vmul.f32 %v640_v55, %v601_v19  ;;  %v670_v55 = vpop.permute.xlu2 %669 }
 0x1ec   :  { %v475_v24 = vpop.f32.mrf.mxu2 }
 0x1ed   :  { %v476_v28 = vadd.f32 %v1420_v62, %v475_v24  ;;  %v709_v24 = vadd.f32 %v708_v13, %v694_v8  ;;  %v665_v47 = vpop.permute.xlu1 %664 }
 0x1ef   :  { %v570_v10 = vsub.f32 %v476_v28, %v1028_v61  ;;  %v710_v33 = vadd.f32 %v709_v24, %v695_v14 }
 0x1f3   :  { %v685_v13 = vpop.permute.xlu2 %684 }
 0x1f4   :  { %v477_v27 = vpop.f32.mrf.mxu2 }
 0x1f5   :  { %v478_v29 = vadd.f32 %v1420_v62, %v477_v27  ;;  %v696_v27 = vmul.f32 %v635_v31, %v600_v9  ;;  %v1040_v31 = vunpack.c.l.bf16 %v1058_v36  ;;  %v680_v9 = vpop.permute.xlu1 %679 }
 0x1f7   :  { %v992_v34 = vpack.c.bf16 %v478_v29, %v476_v28  ;;  %v571_v20 = vsub.f32 %v478_v29, %v1029_v2  ;;  %v602_v28 = vmul.f32 %v570_v10, %v570_v10  ;;  %v711_v40 = vadd.f32 %v710_v33, %v696_v27 }
 0x1f8   :  { %v576_v54 = vsub.f32 %v1428_v4, %v1040_v31  ;;  %v578_v2 = vsub.f32 %v1444_v15, %v1044_v56 }
 0x1f9   :  { %1048 = vst [vmem:[%s1522_s9 + $0x18] sm:$0xff] %v992_v34   ;;  %v660_v34 = vpop.permute.xlu0 %659  ;;  %v603_v29 = vmul.f32 %v571_v20, %v571_v20  ;;  %v698_v41 = vmul.f32 %v645_v59, %v602_v28  ;;  %v712_v44 = vadd.f32 %v711_v40, %v697_v37 }
 0x1fb   :  { %v713_v48 = vadd.f32 %v712_v44, %v698_v41  ;;  %v768_v27 = vpop.xlane.xlu2 %767 }
 0x1fc   :  { %v480_v45 = vpop.f32.mrf.mxu2  ;;  %v769_v16 = vrot.slane %v768_v27, 4 }
 0x1fd   :  { %v481_v3 = vadd.f32 %v1420_v62, %v480_v45  ;;  %v699_v45 = vmul.f32 %v650_v17, %v603_v29  ;;  %v611_v17 = vmul.f32 %v579_v7, %v579_v7 }
 0x1fe   :  { %v770_v28 = vadd.f32 %v769_v16, %v768_v27 }
 0x1ff   :  { %v572_v30 = vsub.f32 %v481_v3, %v1032_v11  ;;  %v714_v57 = vadd.f32 %v713_v48, %v699_v45  ;;  %v610_v11 = vmul.f32 %v578_v2, %v578_v2 }
 0x201   :  { %v604_v42 = vmul.f32 %v572_v30, %v572_v30  ;;  %v675_v61 = vpop.permute.xlu0 %674  ;;  %v706_v19 = vmul.f32 %v685_v13, %v610_v11  ;;  %v771_v30 = vrot.slane %v770_v28, 2 }
 0x203   :  { %v700_v50 = vmul.f32 %v655_v25, %v604_v42 }
 0x204   :  { %v482_v26 = vpop.f32.mrf.mxu2 }
 0x205   :  { %v483_v5 = vadd.f32 %v1420_v62, %v482_v26  ;;  %v715_v63 = vadd.f32 %v714_v57, %v700_v50 }
 0x207   :  { %v997_v12 = vpack.c.bf16 %v483_v5, %v481_v3  ;;  %v573_v38 = vsub.f32 %v483_v5, %v1033_v23  ;;  %v608_v3 = vmul.f32 %v576_v54, %v576_v54 }
 0x209   :  { %1049 = vst [vmem:[%s1522_s9 + $0x20] sm:$0xff] %v997_v12   ;;  %v605_v46 = vmul.f32 %v573_v38, %v573_v38  ;;  %v704_v10 = vmul.f32 %v675_v61, %v608_v3  ;;  %v690_v18 = vpop.permute.xlu0 %689 }
 0x20a   :  { %v707_v23 = vmul.f32 %v690_v18, %v611_v17 }
 0x20b   :  { %v701_v58 = vmul.f32 %v660_v34, %v605_v46 }
 0x20c   :  { %v485_v35 = vpop.f32.mrf.mxu2 }
 0x20d   :  { %v486_v39 = vadd.f32 %v1420_v62, %v485_v35  ;;  %v716_v5 = vadd.f32 %v715_v63, %v701_v58  ;;  %v772_v35 = vadd.f32 %v771_v30, %v770_v28 }
 0x20f   :  { %v574_v43 = vsub.f32 %v486_v39, %v1036_v32  ;;  %v773_v29 = vrot.slane %v772_v35, 1 }
 0x211   :  { %v606_v51 = vmul.f32 %v574_v43, %v574_v43  ;;  %v774_v40 = vadd.f32 %v773_v29, %v772_v35 }
 0x213   :  { %v702_v0 = vmul.f32 %v665_v47, %v606_v51 }
 0x214   :  { %v487_v52 = vpop.f32.mrf.mxu2 }
 0x215   :  { %v488_v59 = vadd.f32 %v1420_v62, %v487_v52  ;;  %v609_v62 = vmul.f32 %v577_v60, %v577_v60  ;;  %v717_v8 = vadd.f32 %v716_v5, %v702_v0 }
 0x217   :  { %v1002_v26 = vpack.c.bf16 %v488_v59, %v486_v39  ;;  %v575_v1 = vsub.f32 %v488_v59, %v1037_v53  ;;  %v705_v14 = vmul.f32 %v680_v9, %v609_v62 }
 0x219   :  { %1050 = vst [vmem:[%s1522_s9 + $0x28] sm:$0xff] %v1002_v26   ;;  %v607_v4 = vmul.f32 %v575_v1, %v575_v1  ;;  %s1150_s9 = smov [#allocation2]  }
 0x21a   :  { %s785_s28 = sshll.u32 %s1150_s9, 4  ;;  %s786_s28 = int_to_ptr.vmem [resolvable:$true] %s785_s28 }
 0x21b   :  { %v703_v6 = vmul.f32 %v670_v55, %v607_v4 }
 0x21d   :  { %v718_v12 = vadd.f32 %v717_v8, %v703_v6 }
 0x21f   :  { %v719_v15 = vadd.f32 %v718_v12, %v704_v10 }
 0x221   :  { %v720_v20 = vadd.f32 %v719_v15, %v705_v14 }
 0x223   :  { %v721_v24 = vadd.f32 %v720_v20, %v706_v19 }
 0x225   :  { %v722_v25 = vadd.f32 %v721_v24, %v707_v23 }
 0x227   :  { %723 = vadd.xlane.f32.xlu1 %v722_v25 }
 0x29a   :  { %v724_v32 = vpop.xlane.xlu1 %723 }
 0x29b   :  { %v725_v33 = vrot.slane %v724_v32, 4 }
 0x29d   :  { %v726_v34 = vadd.f32 %v725_v33, %v724_v32 }
 0x29f   :  { %v727_v36 = vrot.slane %v726_v34, 2 }
 0x2a1   :  { %v728_v37 = vadd.f32 %v727_v36, %v726_v34 }
 0x2a3   :  { %v729_v38 = vrot.slane %v728_v37, 1 }
 0x2a5   :  { %v730_v39 = vadd.f32 %v729_v38, %v728_v37 }
 0x2a7   :  { %1084 = vpush %v730_v39 }
 0x2a8   :  { %1086 = vpush %v774_v40 }
 0x2d8   :  { %s1085_s18 = spop %1084 }
 0x2d9   :  { %v732_v41 = vstv %s1085_s18  ;;  %s1087_s19 = spop %1086 }
 0x2da   :  { %734 = vst.msk [vmem:[#allocation2] sm:$0x1] %vm733_vm1, %v732_v41  ;;  %v776_v42 = vstv %s1087_s19 }
 0x2db   :  { %777 = vst.msk [vmem:[#allocation4] sm:$0x1] %vm733_vm1, %v776_v42  ;;  %790 = dma.vmem_to_hbm [thread:$0]  %s786_s28, 16, %s788_s12, [#allocation3]  }
 0x2dc   :  { %801 = dma.vmem_to_hbm [thread:$0]  %s797_s14, 16, %s799_s17, [#allocation5]  }
 0x2dd   :  { %1145 = dma.done.wait [#allocation3], 16  }
 0x2de   :  { %1146 = vsyncadd [#allocation3], 4294967280 }
 0x2df   :  { %1147 = dma.done.wait [#allocation5], 16  }
 0x2e0   :  { %1148 = vsyncadd [#allocation5], 4294967280 }
 0x2e1   :  { %812 = vsyncpa [#allocation3], 1 }
 0x2e2   :  { %813 = vsyncpa [#allocation5], 1 }

</bundles_post_ra>
